<compile_context>
chip_gen: v7x
topology: tpu7x:2x2x1
jax: 0.10.0
libtpu: 0.0.40
codegen_flags: <defaults>
</compile_context>

<pallas_src>
import jax
import jax.numpy as jnp
from jax import lax
from jax.experimental import pallas as pl
from jax.experimental.pallas import tpu as pltpu
import numpy as np


def _make_upblock_kernel(H, W, neg_slope):
    """Builds the fused UpBlock kernel for an output grid of H x W."""
    HW = H * W
    # Tap offsets (dy, dx): output pixel (i, j) reads input pixel (i+dy, j+dx).
    # ConvTranspose(4,6)/(2,4)/p1 as correlation over the zero-dilated input:
    #   out[co, i, j] = sum_{kh,kw,ci} Wt[ci,co,kh,kw] * U[ci, i+1-kh, j+1-kw]
    offs_up = [(1 - kh, 1 - kw) for kh in range(4) for kw in range(6)]
    # Conv3x3, stride 1, padding 1 (zero pad handled by the border masks).
    offs_3x3 = [(ky - 1, kx - 1) for ky in range(3) for kx in range(3)]

    def kernel(u_ref, x2_ref, rowcol_ref, wt_ref, bt_ref,
               w1_ref, b1_ref, w2_ref, b2_ref, o_ref):
        row = rowcol_ref[0:1, :]   # (1, HW) int32: lane -> image row
        col = rowcol_ref[1:2, :]   # (1, HW) int32: lane -> image col

        def shifted_taps(x, offsets):
            # x: (C, HW). Returns (len(offsets)*C, HW); for tap t the rows
            # [t*C, (t+1)*C) hold x[c, i+dy, j+dx] at lane i*W+j (0 outside).
            pieces = []
            for dy, dx in offsets:
                s = dy * W + dx
                piece = pltpu.roll(x, shift=(-s) % HW, axis=1) if s else x
                conds = []
                if dy < 0:
                    conds.append(row >= -dy)
                if dy > 0:
                    conds.append(row < H - dy)
                if dx < 0:
                    conds.append(col >= -dx)
                if dx > 0:
                    conds.append(col < W - dx)
                if conds:
                    valid = conds[0]
                    for c in conds[1:]:
                        valid = valid & c
                    piece = jnp.where(valid, piece, 0.0)
                pieces.append(piece)
            return jnp.concatenate(pieces, axis=0)

        def leaky(x):
            return jnp.where(x >= 0, x, neg_slope * x)

        def conv(x, offsets, w_ref, b_ref):
            # One fused MXU matmul per conv layer: (Cout, K) @ (K, HW).
            p = shifted_taps(x, offsets)
            y = jnp.dot(w_ref[...], p, preferred_element_type=jnp.float32)
            return leaky(y + b_ref[...])

        # Up: ConvTranspose2d + (folded) BN + LeakyReLU, on the dilated input.
        up = conv(u_ref[0], offs_up, wt_ref, bt_ref)           # (Cout, HW)
        # Channel concat: cat([x2, up], dim=1).
        xcat = jnp.concatenate([x2_ref[0], up], axis=0)        # (2*Cout, HW)
        # Doubleconv: two Conv3x3 + (folded) BN + LeakyReLU.
        h = conv(xcat, offs_3x3, w1_ref, b1_ref)               # (Cout, HW)
        h = conv(h, offs_3x3, w2_ref, b2_ref)                  # (Cout, HW)

        o_ref[0] = h.astype(o_ref.dtype)                       # lane-dense store

    return kernel


def upblock_forward(x1, x2, params, *, neg_slope=0.2, eps=1e-5):
    """UpBlock forward.  x1: (N, Cin, H1, W1), x2: (N, Cout, 2*H1, 4*W1)."""
    N, Cin, H1, W1 = x1.shape
    Cout = params["up_w"].shape[1]
    H, W = 2 * H1, 4 * W1
    HW = H * W
    assert x2.shape == (N, Cout, H, W), x2.shape

    def fold(w_mat, conv_b, gamma, beta, mean, var):
        # y = BN(conv(x) + b) = conv(x; scale*W) + (scale*b + beta - mean*scale)
        scale = gamma / jnp.sqrt(var + eps)
        bias = scale * conv_b + beta - mean * scale
        return w_mat * scale[:, None], bias[:, None]

    # ConvTranspose weight (Cin, Cout, 4, 6) -> (Cout, 24*Cin); column block
    # t = kh*6+kw holds Wt[:, :, kh, kw]^T (matches offs_up ordering).
    wt_mat = jnp.transpose(params["up_w"], (1, 2, 3, 0)).reshape(Cout, 24 * Cin)
    wt_mat, bt = fold(wt_mat, params["up_b"], params["bn0_g"], params["bn0_b"],
                      params["bn0_m"], params["bn0_v"])
    # Conv3x3 weights (Cout, Cin', 3, 3) -> (Cout, 9*Cin') (ky,kx,ci order).
    w1_mat = jnp.transpose(params["c1_w"], (0, 2, 3, 1)).reshape(Cout, 9 * 2 * Cout)
    w1_mat, b1 = fold(w1_mat, params["c1_b"], params["bn1_g"], params["bn1_b"],
                      params["bn1_m"], params["bn1_v"])
    w2_mat = jnp.transpose(params["c2_w"], (0, 2, 3, 1)).reshape(Cout, 9 * Cout)
    w2_mat, b2 = fold(w2_mat, params["c2_b"], params["bn2_g"], params["bn2_b"],
                      params["bn2_m"], params["bn2_v"])

    # Zero-dilated x1 on the output grid: u[:, :, 2i, 4j] = x1[:, :, i, j].
    u = lax.pad(x1, jnp.zeros((), x1.dtype),
                ((0, 0, 0), (0, 0, 0), (0, 1, 1), (0, 3, 3))).reshape(N, Cin, HW)
    x2f = x2.reshape(N, Cout, HW)

    # lane -> (row, col) lookup (trace-time constant, avoids in-kernel div/mod).
    lanes = np.arange(HW, dtype=np.int32)
    rowcol = jnp.asarray(np.stack([lanes // W, lanes % W], axis=0))   # (2, HW)

    Kt, K1, K2 = 24 * Cin, 9 * 2 * Cout, 9 * Cout
    kernel = _make_upblock_kernel(H, W, neg_slope)

    out = pl.pallas_call(
        kernel,
        out_shape=jax.ShapeDtypeStruct((N, Cout, HW), jnp.float32),
        grid_spec=pltpu.PrefetchScalarGridSpec(
            num_scalar_prefetch=0,
            grid=(N,),
            in_specs=[
                pl.BlockSpec((1, Cin, HW), lambda n: (n, 0, 0)),    # dilated x1
                pl.BlockSpec((1, Cout, HW), lambda n: (n, 0, 0)),   # x2
                pl.BlockSpec((2, HW), lambda n: (0, 0)),            # row/col idx
                pl.BlockSpec((Cout, Kt), lambda n: (0, 0)),         # up weights
                pl.BlockSpec((Cout, 1), lambda n: (0, 0)),          # up bias
                pl.BlockSpec((Cout, K1), lambda n: (0, 0)),         # conv1 weights
                pl.BlockSpec((Cout, 1), lambda n: (0, 0)),          # conv1 bias
                pl.BlockSpec((Cout, K2), lambda n: (0, 0)),         # conv2 weights
                pl.BlockSpec((Cout, 1), lambda n: (0, 0)),          # conv2 bias
            ],
            out_specs=pl.BlockSpec((1, Cout, HW), lambda n: (n, 0, 0)),
        ),
        compiler_params=pltpu.CompilerParams(
            dimension_semantics=("parallel",)),
    )(u, x2f, rowcol, wt_mat, bt, w1_mat, b1, w2_mat, b2)

    return out.reshape(N, Cout, H, W)


# ----------------------------- pure-JAX reference -----------------------------

def _bn_eval(x, gamma, beta, mean, var, eps=1e-5):
    inv = gamma / jnp.sqrt(var + eps)
    return (x - mean[None, :, None, None]) * inv[None, :, None, None] \
        + beta[None, :, None, None]


def _leaky(x, s=0.2):
    return jnp.where(x >= 0, x, s * x)


def upblock_reference(x1, x2, p, eps=1e-5):
    dn = ("NCHW", "OIHW", "NCHW")
    hi = lax.Precision.HIGHEST
    # ConvTranspose2d(k=(4,6), s=(2,4), p=1) == lhs-dilated correlation with the
    # spatially-flipped, in/out-swapped kernel.
    k = jnp.flip(jnp.transpose(p["up_w"], (1, 0, 2, 3)), axis=(2, 3))
    y = lax.conv_general_dilated(
        x1, k, window_strides=(1, 1), padding=((2, 2), (4, 4)),
        lhs_dilation=(2, 4), dimension_numbers=dn, precision=hi)
    y = y + p["up_b"][None, :, None, None]
    y = _leaky(_bn_eval(y, p["bn0_g"], p["bn0_b"], p["bn0_m"], p["bn0_v"], eps))

    xc = jnp.concatenate([x2, y], axis=1)

    z = lax.conv_general_dilated(xc, p["c1_w"], (1, 1), ((1, 1), (1, 1)),
                                 dimension_numbers=dn, precision=hi)
    z = z + p["c1_b"][None, :, None, None]
    z = _leaky(_bn_eval(z, p["bn1_g"], p["bn1_b"], p["bn1_m"], p["bn1_v"], eps))

    z = lax.conv_general_dilated(z, p["c2_w"], (1, 1), ((1, 1), (1, 1)),
                                 dimension_numbers=dn, precision=hi)
    z = z + p["c2_b"][None, :, None, None]
    z = _leaky(_bn_eval(z, p["bn2_g"], p["bn2_b"], p["bn2_m"], p["bn2_v"], eps))
    return z


if __name__ == "__main__":
    # UpBlock(in_channels=16, out_channels=8):
    #   x1 (N, 16, 8, 4) --Up--> (N, 8, 16, 16); x2 (N, 8, 16, 16);
    #   output (N, 8, 16, 16).  (Channel counts kept multiples of 8 so all
    #   in-kernel sublane concatenations stay tile-aligned.)
    N, Cin, Cout, H1, W1 = 2, 16, 8, 8, 4
    H, W = 2 * H1, 4 * W1

    key = jax.random.PRNGKey(0)
    ks = jax.random.split(key, 20)

    def normal(k, shape, scale=1.0):
        return scale * jax.random.normal(k, shape, dtype=jnp.float32)

    x1 = normal(ks[0], (N, Cin, H1, W1))
    x2 = normal(ks[1], (N, Cout, H, W))

    params = dict(
        up_w=normal(ks[2], (Cin, Cout, 4, 6), 0.1),
        up_b=normal(ks[3], (Cout,), 0.1),
        bn0_g=1.0 + 0.1 * jax.random.normal(ks[4], (Cout,), dtype=jnp.float32),
        bn0_b=normal(ks[5], (Cout,), 0.1),
        bn0_m=normal(ks[6], (Cout,), 0.1),
        bn0_v=jax.random.uniform(ks[7], (Cout,), dtype=jnp.float32,
                                 minval=0.5, maxval=1.5),
        c1_w=normal(ks[8], (Cout, 2 * Cout, 3, 3), 0.1),
        c1_b=normal(ks[9], (Cout,), 0.1),
        bn1_g=1.0 + 0.1 * jax.random.normal(ks[10], (Cout,), dtype=jnp.float32),
        bn1_b=normal(ks[11], (Cout,), 0.1),
        bn1_m=normal(ks[12], (Cout,), 0.1),
        bn1_v=jax.random.uniform(ks[13], (Cout,), dtype=jnp.float32,
                                 minval=0.5, maxval=1.5),
        c2_w=normal(ks[14], (Cout, Cout, 3, 3), 0.1),
        c2_b=normal(ks[15], (Cout,), 0.1),
        bn2_g=1.0 + 0.1 * jax.random.normal(ks[16], (Cout,), dtype=jnp.float32),
        bn2_b=normal(ks[17], (Cout,), 0.1),
        bn2_m=normal(ks[18], (Cout,), 0.1),
        bn2_v=jax.random.uniform(ks[19], (Cout,), dtype=jnp.float32,
                                 minval=0.5, maxval=1.5),
    )

    out = jax.jit(upblock_forward)(x1, x2, params)
    out = jax.block_until_ready(out)

    ref = upblock_reference(x1, x2, params)

    assert out.shape == (N, Cout, H, W), out.shape
    np.testing.assert_allclose(np.asarray(out), np.asarray(ref),
                               rtol=1e-4, atol=1e-4)
    print("KERNEL_OK")
</pallas_src>

<mosaic_0001>
module attributes {stable_mosaic.version = 11 : i64} {
  func.func @kernel(%arg0: i32, %arg1: memref<1x16x256xf32, #tpu.memory_space<vmem>>, %arg2: memref<1x8x256xf32, #tpu.memory_space<vmem>>, %arg3: memref<2x256xi32, #tpu.memory_space<vmem>>, %arg4: memref<8x384xf32, #tpu.memory_space<vmem>>, %arg5: memref<8x1xf32, #tpu.memory_space<vmem>>, %arg6: memref<8x144xf32, #tpu.memory_space<vmem>>, %arg7: memref<8x1xf32, #tpu.memory_space<vmem>>, %arg8: memref<8x72xf32, #tpu.memory_space<vmem>>, %arg9: memref<8x1xf32, #tpu.memory_space<vmem>>, %arg10: memref<1x8x256xf32, #tpu.memory_space<vmem>>) attributes {dimension_semantics = [#tpu.dimension_semantics<parallel>], iteration_bounds = array<i64: 2>, scalar_prefetch = 0 : i64, scratch_operands = 0 : i64, tpu.core_type = #tpu.core_type<tc>, window_params = [{transform_indices = @transform_0, window_bounds = array<i64: 1, 16, 256>}, {transform_indices = @transform_1, window_bounds = array<i64: 1, 8, 256>}, {pipeline_mode = #tpu.pipeline_mode<synchronous>, transform_indices = @transform_2, window_bounds = array<i64: 2, 256>}, {pipeline_mode = #tpu.pipeline_mode<synchronous>, transform_indices = @transform_3, window_bounds = array<i64: 8, 384>}, {pipeline_mode = #tpu.pipeline_mode<synchronous>, transform_indices = @transform_4, window_bounds = array<i64: 8, 1>}, {pipeline_mode = #tpu.pipeline_mode<synchronous>, transform_indices = @transform_5, window_bounds = array<i64: 8, 144>}, {pipeline_mode = #tpu.pipeline_mode<synchronous>, transform_indices = @transform_6, window_bounds = array<i64: 8, 1>}, {pipeline_mode = #tpu.pipeline_mode<synchronous>, transform_indices = @transform_7, window_bounds = array<i64: 8, 72>}, {pipeline_mode = #tpu.pipeline_mode<synchronous>, transform_indices = @transform_8, window_bounds = array<i64: 8, 1>}, {transform_indices = @transform_9, window_bounds = array<i64: 1, 8, 256>}]} {
    %c0 = arith.constant 0 : index
    %c0_0 = arith.constant 0 : index
    %0 = vector.load %arg3[%c0, %c0_0] : memref<2x256xi32, #tpu.memory_space<vmem>>, vector<1x256xi32>
    %c1 = arith.constant 1 : index
    %c0_1 = arith.constant 0 : index
    %1 = vector.load %arg3[%c1, %c0_1] : memref<2x256xi32, #tpu.memory_space<vmem>>, vector<1x256xi32>
    %c0_2 = arith.constant 0 : index
    %c0_3 = arith.constant 0 : index
    %c0_4 = arith.constant 0 : index
    %2 = vector.load %arg1[%c0_2, %c0_3, %c0_4] : memref<1x16x256xf32, #tpu.memory_space<vmem>>, vector<1x16x256xf32>
    %3 = vector.shape_cast %2 : vector<1x16x256xf32> to vector<16x256xf32>
    %c239_i32 = arith.constant 239 : i32
    %4 = tpu.dynamic_rotate %3 by %c239_i32 dim 1 : vector<16x256xf32>, i32 -> vector<16x256xf32>
    %c15_i32 = arith.constant 15 : i32
    %5 = vector.broadcast %c15_i32 : i32 to vector<1x256xi32>
    %6 = arith.cmpi slt, %0, %5 : vector<1x256xi32>
    %c15_i32_5 = arith.constant 15 : i32
    %7 = vector.broadcast %c15_i32_5 : i32 to vector<1x256xi32>
    %8 = arith.cmpi slt, %1, %7 : vector<1x256xi32>
    %9 = arith.andi %6, %8 : vector<1x256xi1>
    %cst = arith.constant 0.000000e+00 : f32
    %10 = vector.shape_cast %9 : vector<1x256xi1> to vector<1x256xi1>
    %11 = vector.broadcast %10 : vector<1x256xi1> to vector<16x256xi1>
    %12 = vector.broadcast %cst : f32 to vector<16x256xf32>
    %13 = arith.select %11, %4, %12 : vector<16x256xi1>, vector<16x256xf32>
    %c240_i32 = arith.constant 240 : i32
    %14 = tpu.dynamic_rotate %3 by %c240_i32 dim 1 : vector<16x256xf32>, i32 -> vector<16x256xf32>
    %c15_i32_6 = arith.constant 15 : i32
    %15 = vector.broadcast %c15_i32_6 : i32 to vector<1x256xi32>
    %16 = arith.cmpi slt, %0, %15 : vector<1x256xi32>
    %cst_7 = arith.constant 0.000000e+00 : f32
    %17 = vector.shape_cast %16 : vector<1x256xi1> to vector<1x256xi1>
    %18 = vector.broadcast %17 : vector<1x256xi1> to vector<16x256xi1>
    %19 = vector.broadcast %cst_7 : f32 to vector<16x256xf32>
    %20 = arith.select %18, %14, %19 : vector<16x256xi1>, vector<16x256xf32>
    %c241_i32 = arith.constant 241 : i32
    %21 = tpu.dynamic_rotate %3 by %c241_i32 dim 1 : vector<16x256xf32>, i32 -> vector<16x256xf32>
    %c15_i32_8 = arith.constant 15 : i32
    %22 = vector.broadcast %c15_i32_8 : i32 to vector<1x256xi32>
    %23 = arith.cmpi slt, %0, %22 : vector<1x256xi32>
    %c1_i32 = arith.constant 1 : i32
    %24 = vector.broadcast %c1_i32 : i32 to vector<1x256xi32>
    %25 = arith.cmpi sge, %1, %24 : vector<1x256xi32>
    %26 = arith.andi %23, %25 : vector<1x256xi1>
    %cst_9 = arith.constant 0.000000e+00 : f32
    %27 = vector.shape_cast %26 : vector<1x256xi1> to vector<1x256xi1>
    %28 = vector.broadcast %27 : vector<1x256xi1> to vector<16x256xi1>
    %29 = vector.broadcast %cst_9 : f32 to vector<16x256xf32>
    %30 = arith.select %28, %21, %29 : vector<16x256xi1>, vector<16x256xf32>
    %c242_i32 = arith.constant 242 : i32
    %31 = tpu.dynamic_rotate %3 by %c242_i32 dim 1 : vector<16x256xf32>, i32 -> vector<16x256xf32>
    %c15_i32_10 = arith.constant 15 : i32
    %32 = vector.broadcast %c15_i32_10 : i32 to vector<1x256xi32>
    %33 = arith.cmpi slt, %0, %32 : vector<1x256xi32>
    %c2_i32 = arith.constant 2 : i32
    %34 = vector.broadcast %c2_i32 : i32 to vector<1x256xi32>
    %35 = arith.cmpi sge, %1, %34 : vector<1x256xi32>
    %36 = arith.andi %33, %35 : vector<1x256xi1>
    %cst_11 = arith.constant 0.000000e+00 : f32
    %37 = vector.shape_cast %36 : vector<1x256xi1> to vector<1x256xi1>
    %38 = vector.broadcast %37 : vector<1x256xi1> to vector<16x256xi1>
    %39 = vector.broadcast %cst_11 : f32 to vector<16x256xf32>
    %40 = arith.select %38, %31, %39 : vector<16x256xi1>, vector<16x256xf32>
    %c243_i32 = arith.constant 243 : i32
    %41 = tpu.dynamic_rotate %3 by %c243_i32 dim 1 : vector<16x256xf32>, i32 -> vector<16x256xf32>
    %c15_i32_12 = arith.constant 15 : i32
    %42 = vector.broadcast %c15_i32_12 : i32 to vector<1x256xi32>
    %43 = arith.cmpi slt, %0, %42 : vector<1x256xi32>
    %c3_i32 = arith.constant 3 : i32
    %44 = vector.broadcast %c3_i32 : i32 to vector<1x256xi32>
    %45 = arith.cmpi sge, %1, %44 : vector<1x256xi32>
    %46 = arith.andi %43, %45 : vector<1x256xi1>
    %cst_13 = arith.constant 0.000000e+00 : f32
    %47 = vector.shape_cast %46 : vector<1x256xi1> to vector<1x256xi1>
    %48 = vector.broadcast %47 : vector<1x256xi1> to vector<16x256xi1>
    %49 = vector.broadcast %cst_13 : f32 to vector<16x256xf32>
    %50 = arith.select %48, %41, %49 : vector<16x256xi1>, vector<16x256xf32>
    %c244_i32 = arith.constant 244 : i32
    %51 = tpu.dynamic_rotate %3 by %c244_i32 dim 1 : vector<16x256xf32>, i32 -> vector<16x256xf32>
    %c15_i32_14 = arith.constant 15 : i32
    %52 = vector.broadcast %c15_i32_14 : i32 to vector<1x256xi32>
    %53 = arith.cmpi slt, %0, %52 : vector<1x256xi32>
    %c4_i32 = arith.constant 4 : i32
    %54 = vector.broadcast %c4_i32 : i32 to vector<1x256xi32>
    %55 = arith.cmpi sge, %1, %54 : vector<1x256xi32>
    %56 = arith.andi %53, %55 : vector<1x256xi1>
    %cst_15 = arith.constant 0.000000e+00 : f32
    %57 = vector.shape_cast %56 : vector<1x256xi1> to vector<1x256xi1>
    %58 = vector.broadcast %57 : vector<1x256xi1> to vector<16x256xi1>
    %59 = vector.broadcast %cst_15 : f32 to vector<16x256xf32>
    %60 = arith.select %58, %51, %59 : vector<16x256xi1>, vector<16x256xf32>
    %c255_i32 = arith.constant 255 : i32
    %61 = tpu.dynamic_rotate %3 by %c255_i32 dim 1 : vector<16x256xf32>, i32 -> vector<16x256xf32>
    %c15_i32_16 = arith.constant 15 : i32
    %62 = vector.broadcast %c15_i32_16 : i32 to vector<1x256xi32>
    %63 = arith.cmpi slt, %1, %62 : vector<1x256xi32>
    %cst_17 = arith.constant 0.000000e+00 : f32
    %64 = vector.shape_cast %63 : vector<1x256xi1> to vector<1x256xi1>
    %65 = vector.broadcast %64 : vector<1x256xi1> to vector<16x256xi1>
    %66 = vector.broadcast %cst_17 : f32 to vector<16x256xf32>
    %67 = arith.select %65, %61, %66 : vector<16x256xi1>, vector<16x256xf32>
    %c1_i32_18 = arith.constant 1 : i32
    %68 = tpu.dynamic_rotate %3 by %c1_i32_18 dim 1 : vector<16x256xf32>, i32 -> vector<16x256xf32>
    %c1_i32_19 = arith.constant 1 : i32
    %69 = vector.broadcast %c1_i32_19 : i32 to vector<1x256xi32>
    %70 = arith.cmpi sge, %1, %69 : vector<1x256xi32>
    %cst_20 = arith.constant 0.000000e+00 : f32
    %71 = vector.shape_cast %70 : vector<1x256xi1> to vector<1x256xi1>
    %72 = vector.broadcast %71 : vector<1x256xi1> to vector<16x256xi1>
    %73 = vector.broadcast %cst_20 : f32 to vector<16x256xf32>
    %74 = arith.select %72, %68, %73 : vector<16x256xi1>, vector<16x256xf32>
    %c2_i32_21 = arith.constant 2 : i32
    %75 = tpu.dynamic_rotate %3 by %c2_i32_21 dim 1 : vector<16x256xf32>, i32 -> vector<16x256xf32>
    %c2_i32_22 = arith.constant 2 : i32
    %76 = vector.broadcast %c2_i32_22 : i32 to vector<1x256xi32>
    %77 = arith.cmpi sge, %1, %76 : vector<1x256xi32>
    %cst_23 = arith.constant 0.000000e+00 : f32
    %78 = vector.shape_cast %77 : vector<1x256xi1> to vector<1x256xi1>
    %79 = vector.broadcast %78 : vector<1x256xi1> to vector<16x256xi1>
    %80 = vector.broadcast %cst_23 : f32 to vector<16x256xf32>
    %81 = arith.select %79, %75, %80 : vector<16x256xi1>, vector<16x256xf32>
    %c3_i32_24 = arith.constant 3 : i32
    %82 = tpu.dynamic_rotate %3 by %c3_i32_24 dim 1 : vector<16x256xf32>, i32 -> vector<16x256xf32>
    %c3_i32_25 = arith.constant 3 : i32
    %83 = vector.broadcast %c3_i32_25 : i32 to vector<1x256xi32>
    %84 = arith.cmpi sge, %1, %83 : vector<1x256xi32>
    %cst_26 = arith.constant 0.000000e+00 : f32
    %85 = vector.shape_cast %84 : vector<1x256xi1> to vector<1x256xi1>
    %86 = vector.broadcast %85 : vector<1x256xi1> to vector<16x256xi1>
    %87 = vector.broadcast %cst_26 : f32 to vector<16x256xf32>
    %88 = arith.select %86, %82, %87 : vector<16x256xi1>, vector<16x256xf32>
    %c4_i32_27 = arith.constant 4 : i32
    %89 = tpu.dynamic_rotate %3 by %c4_i32_27 dim 1 : vector<16x256xf32>, i32 -> vector<16x256xf32>
    %c4_i32_28 = arith.constant 4 : i32
    %90 = vector.broadcast %c4_i32_28 : i32 to vector<1x256xi32>
    %91 = arith.cmpi sge, %1, %90 : vector<1x256xi32>
    %cst_29 = arith.constant 0.000000e+00 : f32
    %92 = vector.shape_cast %91 : vector<1x256xi1> to vector<1x256xi1>
    %93 = vector.broadcast %92 : vector<1x256xi1> to vector<16x256xi1>
    %94 = vector.broadcast %cst_29 : f32 to vector<16x256xf32>
    %95 = arith.select %93, %89, %94 : vector<16x256xi1>, vector<16x256xf32>
    %c15_i32_30 = arith.constant 15 : i32
    %96 = tpu.dynamic_rotate %3 by %c15_i32_30 dim 1 : vector<16x256xf32>, i32 -> vector<16x256xf32>
    %c1_i32_31 = arith.constant 1 : i32
    %97 = vector.broadcast %c1_i32_31 : i32 to vector<1x256xi32>
    %98 = arith.cmpi sge, %0, %97 : vector<1x256xi32>
    %c15_i32_32 = arith.constant 15 : i32
    %99 = vector.broadcast %c15_i32_32 : i32 to vector<1x256xi32>
    %100 = arith.cmpi slt, %1, %99 : vector<1x256xi32>
    %101 = arith.andi %98, %100 : vector<1x256xi1>
    %cst_33 = arith.constant 0.000000e+00 : f32
    %102 = vector.shape_cast %101 : vector<1x256xi1> to vector<1x256xi1>
    %103 = vector.broadcast %102 : vector<1x256xi1> to vector<16x256xi1>
    %104 = vector.broadcast %cst_33 : f32 to vector<16x256xf32>
    %105 = arith.select %103, %96, %104 : vector<16x256xi1>, vector<16x256xf32>
    %c16_i32 = arith.constant 16 : i32
    %106 = tpu.dynamic_rotate %3 by %c16_i32 dim 1 : vector<16x256xf32>, i32 -> vector<16x256xf32>
    %c1_i32_34 = arith.constant 1 : i32
    %107 = vector.broadcast %c1_i32_34 : i32 to vector<1x256xi32>
    %108 = arith.cmpi sge, %0, %107 : vector<1x256xi32>
    %cst_35 = arith.constant 0.000000e+00 : f32
    %109 = vector.shape_cast %108 : vector<1x256xi1> to vector<1x256xi1>
    %110 = vector.broadcast %109 : vector<1x256xi1> to vector<16x256xi1>
    %111 = vector.broadcast %cst_35 : f32 to vector<16x256xf32>
    %112 = arith.select %110, %106, %111 : vector<16x256xi1>, vector<16x256xf32>
    %c17_i32 = arith.constant 17 : i32
    %113 = tpu.dynamic_rotate %3 by %c17_i32 dim 1 : vector<16x256xf32>, i32 -> vector<16x256xf32>
    %c1_i32_36 = arith.constant 1 : i32
    %114 = vector.broadcast %c1_i32_36 : i32 to vector<1x256xi32>
    %115 = arith.cmpi sge, %0, %114 : vector<1x256xi32>
    %c1_i32_37 = arith.constant 1 : i32
    %116 = vector.broadcast %c1_i32_37 : i32 to vector<1x256xi32>
    %117 = arith.cmpi sge, %1, %116 : vector<1x256xi32>
    %118 = arith.andi %115, %117 : vector<1x256xi1>
    %cst_38 = arith.constant 0.000000e+00 : f32
    %119 = vector.shape_cast %118 : vector<1x256xi1> to vector<1x256xi1>
    %120 = vector.broadcast %119 : vector<1x256xi1> to vector<16x256xi1>
    %121 = vector.broadcast %cst_38 : f32 to vector<16x256xf32>
    %122 = arith.select %120, %113, %121 : vector<16x256xi1>, vector<16x256xf32>
    %c18_i32 = arith.constant 18 : i32
    %123 = tpu.dynamic_rotate %3 by %c18_i32 dim 1 : vector<16x256xf32>, i32 -> vector<16x256xf32>
    %c1_i32_39 = arith.constant 1 : i32
    %124 = vector.broadcast %c1_i32_39 : i32 to vector<1x256xi32>
    %125 = arith.cmpi sge, %0, %124 : vector<1x256xi32>
    %c2_i32_40 = arith.constant 2 : i32
    %126 = vector.broadcast %c2_i32_40 : i32 to vector<1x256xi32>
    %127 = arith.cmpi sge, %1, %126 : vector<1x256xi32>
    %128 = arith.andi %125, %127 : vector<1x256xi1>
    %cst_41 = arith.constant 0.000000e+00 : f32
    %129 = vector.shape_cast %128 : vector<1x256xi1> to vector<1x256xi1>
    %130 = vector.broadcast %129 : vector<1x256xi1> to vector<16x256xi1>
    %131 = vector.broadcast %cst_41 : f32 to vector<16x256xf32>
    %132 = arith.select %130, %123, %131 : vector<16x256xi1>, vector<16x256xf32>
    %c19_i32 = arith.constant 19 : i32
    %133 = tpu.dynamic_rotate %3 by %c19_i32 dim 1 : vector<16x256xf32>, i32 -> vector<16x256xf32>
    %c1_i32_42 = arith.constant 1 : i32
    %134 = vector.broadcast %c1_i32_42 : i32 to vector<1x256xi32>
    %135 = arith.cmpi sge, %0, %134 : vector<1x256xi32>
    %c3_i32_43 = arith.constant 3 : i32
    %136 = vector.broadcast %c3_i32_43 : i32 to vector<1x256xi32>
    %137 = arith.cmpi sge, %1, %136 : vector<1x256xi32>
    %138 = arith.andi %135, %137 : vector<1x256xi1>
    %cst_44 = arith.constant 0.000000e+00 : f32
    %139 = vector.shape_cast %138 : vector<1x256xi1> to vector<1x256xi1>
    %140 = vector.broadcast %139 : vector<1x256xi1> to vector<16x256xi1>
    %141 = vector.broadcast %cst_44 : f32 to vector<16x256xf32>
    %142 = arith.select %140, %133, %141 : vector<16x256xi1>, vector<16x256xf32>
    %c20_i32 = arith.constant 20 : i32
    %143 = tpu.dynamic_rotate %3 by %c20_i32 dim 1 : vector<16x256xf32>, i32 -> vector<16x256xf32>
    %c1_i32_45 = arith.constant 1 : i32
    %144 = vector.broadcast %c1_i32_45 : i32 to vector<1x256xi32>
    %145 = arith.cmpi sge, %0, %144 : vector<1x256xi32>
    %c4_i32_46 = arith.constant 4 : i32
    %146 = vector.broadcast %c4_i32_46 : i32 to vector<1x256xi32>
    %147 = arith.cmpi sge, %1, %146 : vector<1x256xi32>
    %148 = arith.andi %145, %147 : vector<1x256xi1>
    %cst_47 = arith.constant 0.000000e+00 : f32
    %149 = vector.shape_cast %148 : vector<1x256xi1> to vector<1x256xi1>
    %150 = vector.broadcast %149 : vector<1x256xi1> to vector<16x256xi1>
    %151 = vector.broadcast %cst_47 : f32 to vector<16x256xf32>
    %152 = arith.select %150, %143, %151 : vector<16x256xi1>, vector<16x256xf32>
    %c31_i32 = arith.constant 31 : i32
    %153 = tpu.dynamic_rotate %3 by %c31_i32 dim 1 : vector<16x256xf32>, i32 -> vector<16x256xf32>
    %c2_i32_48 = arith.constant 2 : i32
    %154 = vector.broadcast %c2_i32_48 : i32 to vector<1x256xi32>
    %155 = arith.cmpi sge, %0, %154 : vector<1x256xi32>
    %c15_i32_49 = arith.constant 15 : i32
    %156 = vector.broadcast %c15_i32_49 : i32 to vector<1x256xi32>
    %157 = arith.cmpi slt, %1, %156 : vector<1x256xi32>
    %158 = arith.andi %155, %157 : vector<1x256xi1>
    %cst_50 = arith.constant 0.000000e+00 : f32
    %159 = vector.shape_cast %158 : vector<1x256xi1> to vector<1x256xi1>
    %160 = vector.broadcast %159 : vector<1x256xi1> to vector<16x256xi1>
    %161 = vector.broadcast %cst_50 : f32 to vector<16x256xf32>
    %162 = arith.select %160, %153, %161 : vector<16x256xi1>, vector<16x256xf32>
    %c32_i32 = arith.constant 32 : i32
    %163 = tpu.dynamic_rotate %3 by %c32_i32 dim 1 : vector<16x256xf32>, i32 -> vector<16x256xf32>
    %c2_i32_51 = arith.constant 2 : i32
    %164 = vector.broadcast %c2_i32_51 : i32 to vector<1x256xi32>
    %165 = arith.cmpi sge, %0, %164 : vector<1x256xi32>
    %cst_52 = arith.constant 0.000000e+00 : f32
    %166 = vector.shape_cast %165 : vector<1x256xi1> to vector<1x256xi1>
    %167 = vector.broadcast %166 : vector<1x256xi1> to vector<16x256xi1>
    %168 = vector.broadcast %cst_52 : f32 to vector<16x256xf32>
    %169 = arith.select %167, %163, %168 : vector<16x256xi1>, vector<16x256xf32>
    %c33_i32 = arith.constant 33 : i32
    %170 = tpu.dynamic_rotate %3 by %c33_i32 dim 1 : vector<16x256xf32>, i32 -> vector<16x256xf32>
    %c2_i32_53 = arith.constant 2 : i32
    %171 = vector.broadcast %c2_i32_53 : i32 to vector<1x256xi32>
    %172 = arith.cmpi sge, %0, %171 : vector<1x256xi32>
    %c1_i32_54 = arith.constant 1 : i32
    %173 = vector.broadcast %c1_i32_54 : i32 to vector<1x256xi32>
    %174 = arith.cmpi sge, %1, %173 : vector<1x256xi32>
    %175 = arith.andi %172, %174 : vector<1x256xi1>
    %cst_55 = arith.constant 0.000000e+00 : f32
    %176 = vector.shape_cast %175 : vector<1x256xi1> to vector<1x256xi1>
    %177 = vector.broadcast %176 : vector<1x256xi1> to vector<16x256xi1>
    %178 = vector.broadcast %cst_55 : f32 to vector<16x256xf32>
    %179 = arith.select %177, %170, %178 : vector<16x256xi1>, vector<16x256xf32>
    %c34_i32 = arith.constant 34 : i32
    %180 = tpu.dynamic_rotate %3 by %c34_i32 dim 1 : vector<16x256xf32>, i32 -> vector<16x256xf32>
    %c2_i32_56 = arith.constant 2 : i32
    %181 = vector.broadcast %c2_i32_56 : i32 to vector<1x256xi32>
    %182 = arith.cmpi sge, %0, %181 : vector<1x256xi32>
    %c2_i32_57 = arith.constant 2 : i32
    %183 = vector.broadcast %c2_i32_57 : i32 to vector<1x256xi32>
    %184 = arith.cmpi sge, %1, %183 : vector<1x256xi32>
    %185 = arith.andi %182, %184 : vector<1x256xi1>
    %cst_58 = arith.constant 0.000000e+00 : f32
    %186 = vector.shape_cast %185 : vector<1x256xi1> to vector<1x256xi1>
    %187 = vector.broadcast %186 : vector<1x256xi1> to vector<16x256xi1>
    %188 = vector.broadcast %cst_58 : f32 to vector<16x256xf32>
    %189 = arith.select %187, %180, %188 : vector<16x256xi1>, vector<16x256xf32>
    %c35_i32 = arith.constant 35 : i32
    %190 = tpu.dynamic_rotate %3 by %c35_i32 dim 1 : vector<16x256xf32>, i32 -> vector<16x256xf32>
    %c2_i32_59 = arith.constant 2 : i32
    %191 = vector.broadcast %c2_i32_59 : i32 to vector<1x256xi32>
    %192 = arith.cmpi sge, %0, %191 : vector<1x256xi32>
    %c3_i32_60 = arith.constant 3 : i32
    %193 = vector.broadcast %c3_i32_60 : i32 to vector<1x256xi32>
    %194 = arith.cmpi sge, %1, %193 : vector<1x256xi32>
    %195 = arith.andi %192, %194 : vector<1x256xi1>
    %cst_61 = arith.constant 0.000000e+00 : f32
    %196 = vector.shape_cast %195 : vector<1x256xi1> to vector<1x256xi1>
    %197 = vector.broadcast %196 : vector<1x256xi1> to vector<16x256xi1>
    %198 = vector.broadcast %cst_61 : f32 to vector<16x256xf32>
    %199 = arith.select %197, %190, %198 : vector<16x256xi1>, vector<16x256xf32>
    %c36_i32 = arith.constant 36 : i32
    %200 = tpu.dynamic_rotate %3 by %c36_i32 dim 1 : vector<16x256xf32>, i32 -> vector<16x256xf32>
    %c2_i32_62 = arith.constant 2 : i32
    %201 = vector.broadcast %c2_i32_62 : i32 to vector<1x256xi32>
    %202 = arith.cmpi sge, %0, %201 : vector<1x256xi32>
    %c4_i32_63 = arith.constant 4 : i32
    %203 = vector.broadcast %c4_i32_63 : i32 to vector<1x256xi32>
    %204 = arith.cmpi sge, %1, %203 : vector<1x256xi32>
    %205 = arith.andi %202, %204 : vector<1x256xi1>
    %cst_64 = arith.constant 0.000000e+00 : f32
    %206 = vector.shape_cast %205 : vector<1x256xi1> to vector<1x256xi1>
    %207 = vector.broadcast %206 : vector<1x256xi1> to vector<16x256xi1>
    %208 = vector.broadcast %cst_64 : f32 to vector<16x256xf32>
    %209 = arith.select %207, %200, %208 : vector<16x256xi1>, vector<16x256xf32>
    %210 = tpu.concatenate %13, %20, %30, %40, %50, %60, %67, %3, %74, %81, %88, %95, %105, %112, %122, %132 in 0 : vector<16x256xf32>, vector<16x256xf32>, vector<16x256xf32>, vector<16x256xf32>, vector<16x256xf32>, vector<16x256xf32>, vector<16x256xf32>, vector<16x256xf32>, vector<16x256xf32>, vector<16x256xf32>, vector<16x256xf32>, vector<16x256xf32>, vector<16x256xf32>, vector<16x256xf32>, vector<16x256xf32>, vector<16x256xf32> -> vector<256x256xf32>
    %211 = tpu.concatenate %142, %152, %162, %169, %179, %189, %199, %209 in 0 : vector<16x256xf32>, vector<16x256xf32>, vector<16x256xf32>, vector<16x256xf32>, vector<16x256xf32>, vector<16x256xf32>, vector<16x256xf32>, vector<16x256xf32> -> vector<128x256xf32>
    %212 = tpu.concatenate %210, %211 in 0 : vector<256x256xf32>, vector<128x256xf32> -> vector<384x256xf32>
    %c0_65 = arith.constant 0 : index
    %c0_66 = arith.constant 0 : index
    %213 = vector.load %arg4[%c0_65, %c0_66] : memref<8x384xf32, #tpu.memory_space<vmem>>, vector<8x384xf32>
    %cst_67 = arith.constant dense<0.000000e+00> : vector<8x256xf32>
    %214 = tpu.matmul %213, %212, %cst_67 {dimension_numbers = #tpu.dot_dimension_numbers<[1], [0], [0], [1], [0, 0, 1, 1], [], []>} : vector<8x384xf32>, vector<384x256xf32>, vector<8x256xf32> -> vector<8x256xf32>
    %c0_68 = arith.constant 0 : index
    %c0_69 = arith.constant 0 : index
    %215 = vector.load %arg5[%c0_68, %c0_69] : memref<8x1xf32, #tpu.memory_space<vmem>>, vector<8x1xf32>
    %216 = vector.broadcast %215 : vector<8x1xf32> to vector<8x256xf32>
    %217 = arith.addf %214, %216 : vector<8x256xf32>
    %cst_70 = arith.constant 0.000000e+00 : f32
    %218 = vector.broadcast %cst_70 : f32 to vector<8x256xf32>
    %219 = arith.cmpf oge, %217, %218 : vector<8x256xf32>
    %cst_71 = arith.constant 2.000000e-01 : f32
    %220 = vector.broadcast %cst_71 : f32 to vector<8x256xf32>
    %221 = arith.mulf %220, %217 : vector<8x256xf32>
    %222 = arith.select %219, %217, %221 : vector<8x256xi1>, vector<8x256xf32>
    %c0_72 = arith.constant 0 : index
    %c0_73 = arith.constant 0 : index
    %c0_74 = arith.constant 0 : index
    %223 = vector.load %arg2[%c0_72, %c0_73, %c0_74] : memref<1x8x256xf32, #tpu.memory_space<vmem>>, vector<1x8x256xf32>
    %224 = vector.shape_cast %223 : vector<1x8x256xf32> to vector<8x256xf32>
    %225 = tpu.concatenate %224, %222 in 0 : vector<8x256xf32>, vector<8x256xf32> -> vector<16x256xf32>
    %c17_i32_75 = arith.constant 17 : i32
    %226 = tpu.dynamic_rotate %225 by %c17_i32_75 dim 1 : vector<16x256xf32>, i32 -> vector<16x256xf32>
    %c1_i32_76 = arith.constant 1 : i32
    %227 = vector.broadcast %c1_i32_76 : i32 to vector<1x256xi32>
    %228 = arith.cmpi sge, %0, %227 : vector<1x256xi32>
    %c1_i32_77 = arith.constant 1 : i32
    %229 = vector.broadcast %c1_i32_77 : i32 to vector<1x256xi32>
    %230 = arith.cmpi sge, %1, %229 : vector<1x256xi32>
    %231 = arith.andi %228, %230 : vector<1x256xi1>
    %cst_78 = arith.constant 0.000000e+00 : f32
    %232 = vector.shape_cast %231 : vector<1x256xi1> to vector<1x256xi1>
    %233 = vector.broadcast %232 : vector<1x256xi1> to vector<16x256xi1>
    %234 = vector.broadcast %cst_78 : f32 to vector<16x256xf32>
    %235 = arith.select %233, %226, %234 : vector<16x256xi1>, vector<16x256xf32>
    %c16_i32_79 = arith.constant 16 : i32
    %236 = tpu.dynamic_rotate %225 by %c16_i32_79 dim 1 : vector<16x256xf32>, i32 -> vector<16x256xf32>
    %c1_i32_80 = arith.constant 1 : i32
    %237 = vector.broadcast %c1_i32_80 : i32 to vector<1x256xi32>
    %238 = arith.cmpi sge, %0, %237 : vector<1x256xi32>
    %cst_81 = arith.constant 0.000000e+00 : f32
    %239 = vector.shape_cast %238 : vector<1x256xi1> to vector<1x256xi1>
    %240 = vector.broadcast %239 : vector<1x256xi1> to vector<16x256xi1>
    %241 = vector.broadcast %cst_81 : f32 to vector<16x256xf32>
    %242 = arith.select %240, %236, %241 : vector<16x256xi1>, vector<16x256xf32>
    %c15_i32_82 = arith.constant 15 : i32
    %243 = tpu.dynamic_rotate %225 by %c15_i32_82 dim 1 : vector<16x256xf32>, i32 -> vector<16x256xf32>
    %c1_i32_83 = arith.constant 1 : i32
    %244 = vector.broadcast %c1_i32_83 : i32 to vector<1x256xi32>
    %245 = arith.cmpi sge, %0, %244 : vector<1x256xi32>
    %c15_i32_84 = arith.constant 15 : i32
    %246 = vector.broadcast %c15_i32_84 : i32 to vector<1x256xi32>
    %247 = arith.cmpi slt, %1, %246 : vector<1x256xi32>
    %248 = arith.andi %245, %247 : vector<1x256xi1>
    %cst_85 = arith.constant 0.000000e+00 : f32
    %249 = vector.shape_cast %248 : vector<1x256xi1> to vector<1x256xi1>
    %250 = vector.broadcast %249 : vector<1x256xi1> to vector<16x256xi1>
    %251 = vector.broadcast %cst_85 : f32 to vector<16x256xf32>
    %252 = arith.select %250, %243, %251 : vector<16x256xi1>, vector<16x256xf32>
    %c1_i32_86 = arith.constant 1 : i32
    %253 = tpu.dynamic_rotate %225 by %c1_i32_86 dim 1 : vector<16x256xf32>, i32 -> vector<16x256xf32>
    %c1_i32_87 = arith.constant 1 : i32
    %254 = vector.broadcast %c1_i32_87 : i32 to vector<1x256xi32>
    %255 = arith.cmpi sge, %1, %254 : vector<1x256xi32>
    %cst_88 = arith.constant 0.000000e+00 : f32
    %256 = vector.shape_cast %255 : vector<1x256xi1> to vector<1x256xi1>
    %257 = vector.broadcast %256 : vector<1x256xi1> to vector<16x256xi1>
    %258 = vector.broadcast %cst_88 : f32 to vector<16x256xf32>
    %259 = arith.select %257, %253, %258 : vector<16x256xi1>, vector<16x256xf32>
    %c255_i32_89 = arith.constant 255 : i32
    %260 = tpu.dynamic_rotate %225 by %c255_i32_89 dim 1 : vector<16x256xf32>, i32 -> vector<16x256xf32>
    %c15_i32_90 = arith.constant 15 : i32
    %261 = vector.broadcast %c15_i32_90 : i32 to vector<1x256xi32>
    %262 = arith.cmpi slt, %1, %261 : vector<1x256xi32>
    %cst_91 = arith.constant 0.000000e+00 : f32
    %263 = vector.shape_cast %262 : vector<1x256xi1> to vector<1x256xi1>
    %264 = vector.broadcast %263 : vector<1x256xi1> to vector<16x256xi1>
    %265 = vector.broadcast %cst_91 : f32 to vector<16x256xf32>
    %266 = arith.select %264, %260, %265 : vector<16x256xi1>, vector<16x256xf32>
    %c241_i32_92 = arith.constant 241 : i32
    %267 = tpu.dynamic_rotate %225 by %c241_i32_92 dim 1 : vector<16x256xf32>, i32 -> vector<16x256xf32>
    %c15_i32_93 = arith.constant 15 : i32
    %268 = vector.broadcast %c15_i32_93 : i32 to vector<1x256xi32>
    %269 = arith.cmpi slt, %0, %268 : vector<1x256xi32>
    %c1_i32_94 = arith.constant 1 : i32
    %270 = vector.broadcast %c1_i32_94 : i32 to vector<1x256xi32>
    %271 = arith.cmpi sge, %1, %270 : vector<1x256xi32>
    %272 = arith.andi %269, %271 : vector<1x256xi1>
    %cst_95 = arith.constant 0.000000e+00 : f32
    %273 = vector.shape_cast %272 : vector<1x256xi1> to vector<1x256xi1>
    %274 = vector.broadcast %273 : vector<1x256xi1> to vector<16x256xi1>
    %275 = vector.broadcast %cst_95 : f32 to vector<16x256xf32>
    %276 = arith.select %274, %267, %275 : vector<16x256xi1>, vector<16x256xf32>
    %c240_i32_96 = arith.constant 240 : i32
    %277 = tpu.dynamic_rotate %225 by %c240_i32_96 dim 1 : vector<16x256xf32>, i32 -> vector<16x256xf32>
    %c15_i32_97 = arith.constant 15 : i32
    %278 = vector.broadcast %c15_i32_97 : i32 to vector<1x256xi32>
    %279 = arith.cmpi slt, %0, %278 : vector<1x256xi32>
    %cst_98 = arith.constant 0.000000e+00 : f32
    %280 = vector.shape_cast %279 : vector<1x256xi1> to vector<1x256xi1>
    %281 = vector.broadcast %280 : vector<1x256xi1> to vector<16x256xi1>
    %282 = vector.broadcast %cst_98 : f32 to vector<16x256xf32>
    %283 = arith.select %281, %277, %282 : vector<16x256xi1>, vector<16x256xf32>
    %c239_i32_99 = arith.constant 239 : i32
    %284 = tpu.dynamic_rotate %225 by %c239_i32_99 dim 1 : vector<16x256xf32>, i32 -> vector<16x256xf32>
    %c15_i32_100 = arith.constant 15 : i32
    %285 = vector.broadcast %c15_i32_100 : i32 to vector<1x256xi32>
    %286 = arith.cmpi slt, %0, %285 : vector<1x256xi32>
    %c15_i32_101 = arith.constant 15 : i32
    %287 = vector.broadcast %c15_i32_101 : i32 to vector<1x256xi32>
    %288 = arith.cmpi slt, %1, %287 : vector<1x256xi32>
    %289 = arith.andi %286, %288 : vector<1x256xi1>
    %cst_102 = arith.constant 0.000000e+00 : f32
    %290 = vector.shape_cast %289 : vector<1x256xi1> to vector<1x256xi1>
    %291 = vector.broadcast %290 : vector<1x256xi1> to vector<16x256xi1>
    %292 = vector.broadcast %cst_102 : f32 to vector<16x256xf32>
    %293 = arith.select %291, %284, %292 : vector<16x256xi1>, vector<16x256xf32>
    %294 = tpu.concatenate %235, %242, %252, %259, %225, %266, %276, %283, %293 in 0 : vector<16x256xf32>, vector<16x256xf32>, vector<16x256xf32>, vector<16x256xf32>, vector<16x256xf32>, vector<16x256xf32>, vector<16x256xf32>, vector<16x256xf32>, vector<16x256xf32> -> vector<144x256xf32>
    %c0_103 = arith.constant 0 : index
    %c0_104 = arith.constant 0 : index
    %295 = vector.load %arg6[%c0_103, %c0_104] : memref<8x144xf32, #tpu.memory_space<vmem>>, vector<8x144xf32>
    %cst_105 = arith.constant dense<0.000000e+00> : vector<8x256xf32>
    %296 = tpu.matmul %295, %294, %cst_105 {dimension_numbers = #tpu.dot_dimension_numbers<[1], [0], [0], [1], [0, 0, 1, 1], [], []>} : vector<8x144xf32>, vector<144x256xf32>, vector<8x256xf32> -> vector<8x256xf32>
    %c0_106 = arith.constant 0 : index
    %c0_107 = arith.constant 0 : index
    %297 = vector.load %arg7[%c0_106, %c0_107] : memref<8x1xf32, #tpu.memory_space<vmem>>, vector<8x1xf32>
    %298 = vector.broadcast %297 : vector<8x1xf32> to vector<8x256xf32>
    %299 = arith.addf %296, %298 : vector<8x256xf32>
    %cst_108 = arith.constant 0.000000e+00 : f32
    %300 = vector.broadcast %cst_108 : f32 to vector<8x256xf32>
    %301 = arith.cmpf oge, %299, %300 : vector<8x256xf32>
    %cst_109 = arith.constant 2.000000e-01 : f32
    %302 = vector.broadcast %cst_109 : f32 to vector<8x256xf32>
    %303 = arith.mulf %302, %299 : vector<8x256xf32>
    %304 = arith.select %301, %299, %303 : vector<8x256xi1>, vector<8x256xf32>
    %c17_i32_110 = arith.constant 17 : i32
    %305 = tpu.dynamic_rotate %304 by %c17_i32_110 dim 1 : vector<8x256xf32>, i32 -> vector<8x256xf32>
    %c1_i32_111 = arith.constant 1 : i32
    %306 = vector.broadcast %c1_i32_111 : i32 to vector<1x256xi32>
    %307 = arith.cmpi sge, %0, %306 : vector<1x256xi32>
    %c1_i32_112 = arith.constant 1 : i32
    %308 = vector.broadcast %c1_i32_112 : i32 to vector<1x256xi32>
    %309 = arith.cmpi sge, %1, %308 : vector<1x256xi32>
    %310 = arith.andi %307, %309 : vector<1x256xi1>
    %cst_113 = arith.constant 0.000000e+00 : f32
    %311 = vector.shape_cast %310 : vector<1x256xi1> to vector<1x256xi1>
    %312 = vector.broadcast %311 : vector<1x256xi1> to vector<8x256xi1>
    %313 = vector.broadcast %cst_113 : f32 to vector<8x256xf32>
    %314 = arith.select %312, %305, %313 : vector<8x256xi1>, vector<8x256xf32>
    %c16_i32_114 = arith.constant 16 : i32
    %315 = tpu.dynamic_rotate %304 by %c16_i32_114 dim 1 : vector<8x256xf32>, i32 -> vector<8x256xf32>
    %c1_i32_115 = arith.constant 1 : i32
    %316 = vector.broadcast %c1_i32_115 : i32 to vector<1x256xi32>
    %317 = arith.cmpi sge, %0, %316 : vector<1x256xi32>
    %cst_116 = arith.constant 0.000000e+00 : f32
    %318 = vector.shape_cast %317 : vector<1x256xi1> to vector<1x256xi1>
    %319 = vector.broadcast %318 : vector<1x256xi1> to vector<8x256xi1>
    %320 = vector.broadcast %cst_116 : f32 to vector<8x256xf32>
    %321 = arith.select %319, %315, %320 : vector<8x256xi1>, vector<8x256xf32>
    %c15_i32_117 = arith.constant 15 : i32
    %322 = tpu.dynamic_rotate %304 by %c15_i32_117 dim 1 : vector<8x256xf32>, i32 -> vector<8x256xf32>
    %c1_i32_118 = arith.constant 1 : i32
    %323 = vector.broadcast %c1_i32_118 : i32 to vector<1x256xi32>
    %324 = arith.cmpi sge, %0, %323 : vector<1x256xi32>
    %c15_i32_119 = arith.constant 15 : i32
    %325 = vector.broadcast %c15_i32_119 : i32 to vector<1x256xi32>
    %326 = arith.cmpi slt, %1, %325 : vector<1x256xi32>
    %327 = arith.andi %324, %326 : vector<1x256xi1>
    %cst_120 = arith.constant 0.000000e+00 : f32
    %328 = vector.shape_cast %327 : vector<1x256xi1> to vector<1x256xi1>
    %329 = vector.broadcast %328 : vector<1x256xi1> to vector<8x256xi1>
    %330 = vector.broadcast %cst_120 : f32 to vector<8x256xf32>
    %331 = arith.select %329, %322, %330 : vector<8x256xi1>, vector<8x256xf32>
    %c1_i32_121 = arith.constant 1 : i32
    %332 = tpu.dynamic_rotate %304 by %c1_i32_121 dim 1 : vector<8x256xf32>, i32 -> vector<8x256xf32>
    %c1_i32_122 = arith.constant 1 : i32
    %333 = vector.broadcast %c1_i32_122 : i32 to vector<1x256xi32>
    %334 = arith.cmpi sge, %1, %333 : vector<1x256xi32>
    %cst_123 = arith.constant 0.000000e+00 : f32
    %335 = vector.shape_cast %334 : vector<1x256xi1> to vector<1x256xi1>
    %336 = vector.broadcast %335 : vector<1x256xi1> to vector<8x256xi1>
    %337 = vector.broadcast %cst_123 : f32 to vector<8x256xf32>
    %338 = arith.select %336, %332, %337 : vector<8x256xi1>, vector<8x256xf32>
    %c255_i32_124 = arith.constant 255 : i32
    %339 = tpu.dynamic_rotate %304 by %c255_i32_124 dim 1 : vector<8x256xf32>, i32 -> vector<8x256xf32>
    %c15_i32_125 = arith.constant 15 : i32
    %340 = vector.broadcast %c15_i32_125 : i32 to vector<1x256xi32>
    %341 = arith.cmpi slt, %1, %340 : vector<1x256xi32>
    %cst_126 = arith.constant 0.000000e+00 : f32
    %342 = vector.shape_cast %341 : vector<1x256xi1> to vector<1x256xi1>
    %343 = vector.broadcast %342 : vector<1x256xi1> to vector<8x256xi1>
    %344 = vector.broadcast %cst_126 : f32 to vector<8x256xf32>
    %345 = arith.select %343, %339, %344 : vector<8x256xi1>, vector<8x256xf32>
    %c241_i32_127 = arith.constant 241 : i32
    %346 = tpu.dynamic_rotate %304 by %c241_i32_127 dim 1 : vector<8x256xf32>, i32 -> vector<8x256xf32>
    %c15_i32_128 = arith.constant 15 : i32
    %347 = vector.broadcast %c15_i32_128 : i32 to vector<1x256xi32>
    %348 = arith.cmpi slt, %0, %347 : vector<1x256xi32>
    %c1_i32_129 = arith.constant 1 : i32
    %349 = vector.broadcast %c1_i32_129 : i32 to vector<1x256xi32>
    %350 = arith.cmpi sge, %1, %349 : vector<1x256xi32>
    %351 = arith.andi %348, %350 : vector<1x256xi1>
    %cst_130 = arith.constant 0.000000e+00 : f32
    %352 = vector.shape_cast %351 : vector<1x256xi1> to vector<1x256xi1>
    %353 = vector.broadcast %352 : vector<1x256xi1> to vector<8x256xi1>
    %354 = vector.broadcast %cst_130 : f32 to vector<8x256xf32>
    %355 = arith.select %353, %346, %354 : vector<8x256xi1>, vector<8x256xf32>
    %c240_i32_131 = arith.constant 240 : i32
    %356 = tpu.dynamic_rotate %304 by %c240_i32_131 dim 1 : vector<8x256xf32>, i32 -> vector<8x256xf32>
    %c15_i32_132 = arith.constant 15 : i32
    %357 = vector.broadcast %c15_i32_132 : i32 to vector<1x256xi32>
    %358 = arith.cmpi slt, %0, %357 : vector<1x256xi32>
    %cst_133 = arith.constant 0.000000e+00 : f32
    %359 = vector.shape_cast %358 : vector<1x256xi1> to vector<1x256xi1>
    %360 = vector.broadcast %359 : vector<1x256xi1> to vector<8x256xi1>
    %361 = vector.broadcast %cst_133 : f32 to vector<8x256xf32>
    %362 = arith.select %360, %356, %361 : vector<8x256xi1>, vector<8x256xf32>
    %c239_i32_134 = arith.constant 239 : i32
    %363 = tpu.dynamic_rotate %304 by %c239_i32_134 dim 1 : vector<8x256xf32>, i32 -> vector<8x256xf32>
    %c15_i32_135 = arith.constant 15 : i32
    %364 = vector.broadcast %c15_i32_135 : i32 to vector<1x256xi32>
    %365 = arith.cmpi slt, %0, %364 : vector<1x256xi32>
    %c15_i32_136 = arith.constant 15 : i32
    %366 = vector.broadcast %c15_i32_136 : i32 to vector<1x256xi32>
    %367 = arith.cmpi slt, %1, %366 : vector<1x256xi32>
    %368 = arith.andi %365, %367 : vector<1x256xi1>
    %cst_137 = arith.constant 0.000000e+00 : f32
    %369 = vector.shape_cast %368 : vector<1x256xi1> to vector<1x256xi1>
    %370 = vector.broadcast %369 : vector<1x256xi1> to vector<8x256xi1>
    %371 = vector.broadcast %cst_137 : f32 to vector<8x256xf32>
    %372 = arith.select %370, %363, %371 : vector<8x256xi1>, vector<8x256xf32>
    %373 = tpu.concatenate %314, %321, %331, %338, %304, %345, %355, %362, %372 in 0 : vector<8x256xf32>, vector<8x256xf32>, vector<8x256xf32>, vector<8x256xf32>, vector<8x256xf32>, vector<8x256xf32>, vector<8x256xf32>, vector<8x256xf32>, vector<8x256xf32> -> vector<72x256xf32>
    %c0_138 = arith.constant 0 : index
    %c0_139 = arith.constant 0 : index
    %374 = vector.load %arg8[%c0_138, %c0_139] : memref<8x72xf32, #tpu.memory_space<vmem>>, vector<8x72xf32>
    %cst_140 = arith.constant dense<0.000000e+00> : vector<8x256xf32>
    %375 = tpu.matmul %374, %373, %cst_140 {dimension_numbers = #tpu.dot_dimension_numbers<[1], [0], [0], [1], [0, 0, 1, 1], [], []>} : vector<8x72xf32>, vector<72x256xf32>, vector<8x256xf32> -> vector<8x256xf32>
    %c0_141 = arith.constant 0 : index
    %c0_142 = arith.constant 0 : index
    %376 = vector.load %arg9[%c0_141, %c0_142] : memref<8x1xf32, #tpu.memory_space<vmem>>, vector<8x1xf32>
    %377 = vector.broadcast %376 : vector<8x1xf32> to vector<8x256xf32>
    %378 = arith.addf %375, %377 : vector<8x256xf32>
    %cst_143 = arith.constant 0.000000e+00 : f32
    %379 = vector.broadcast %cst_143 : f32 to vector<8x256xf32>
    %380 = arith.cmpf oge, %378, %379 : vector<8x256xf32>
    %cst_144 = arith.constant 2.000000e-01 : f32
    %381 = vector.broadcast %cst_144 : f32 to vector<8x256xf32>
    %382 = arith.mulf %381, %378 : vector<8x256xf32>
    %383 = arith.select %380, %378, %382 : vector<8x256xi1>, vector<8x256xf32>
    %c0_145 = arith.constant 0 : index
    %c0_146 = arith.constant 0 : index
    %c0_147 = arith.constant 0 : index
    %384 = vector.load %arg10[%c0_145, %c0_146, %c0_147] : memref<1x8x256xf32, #tpu.memory_space<vmem>>, vector<1x8x256xf32>
    %385 = vector.shape_cast %384 : vector<1x8x256xf32> to vector<8x256xf32>
    %386 = vector.shape_cast %383 : vector<8x256xf32> to vector<1x8x256xf32>
    tpu.vector_store %arg10[%c0_145, %c0_146, %c0_147], %386 {strides = array<i32>} : memref<1x8x256xf32, #tpu.memory_space<vmem>>, vector<1x8x256xf32>,
    return
  }
  func.func @transform_0(%arg0: i32) -> (i32, i32, i32) {
    %c0_i32 = arith.constant 0 : i32
    %c0_i32_0 = arith.constant 0 : i32
    %c0_i32_1 = arith.constant 0 : i32
    return %arg0, %c0_i32, %c0_i32_0 : i32, i32, i32
  }
  func.func @transform_1(%arg0: i32) -> (i32, i32, i32) {
    %c0_i32 = arith.constant 0 : i32
    %c0_i32_0 = arith.constant 0 : i32
    %c0_i32_1 = arith.constant 0 : i32
    return %arg0, %c0_i32, %c0_i32_0 : i32, i32, i32
  }
  func.func @transform_2(%arg0: i32) -> (i32, i32) {
    %c0_i32 = arith.constant 0 : i32
    %c0_i32_0 = arith.constant 0 : i32
    %c0_i32_1 = arith.constant 0 : i32
    return %c0_i32, %c0_i32_0 : i32, i32
  }
  func.func @transform_3(%arg0: i32) -> (i32, i32) {
    %c0_i32 = arith.constant 0 : i32
    %c0_i32_0 = arith.constant 0 : i32
    %c0_i32_1 = arith.constant 0 : i32
    return %c0_i32, %c0_i32_0 : i32, i32
  }
  func.func @transform_4(%arg0: i32) -> (i32, i32) {
    %c0_i32 = arith.constant 0 : i32
    %c0_i32_0 = arith.constant 0 : i32
    %c0_i32_1 = arith.constant 0 : i32
    return %c0_i32, %c0_i32_0 : i32, i32
  }
  func.func @transform_5(%arg0: i32) -> (i32, i32) {
    %c0_i32 = arith.constant 0 : i32
    %c0_i32_0 = arith.constant 0 : i32
    %c0_i32_1 = arith.constant 0 : i32
    return %c0_i32, %c0_i32_0 : i32, i32
  }
  func.func @transform_6(%arg0: i32) -> (i32, i32) {
    %c0_i32 = arith.constant 0 : i32
    %c0_i32_0 = arith.constant 0 : i32
    %c0_i32_1 = arith.constant 0 : i32
    return %c0_i32, %c0_i32_0 : i32, i32
  }
  func.func @transform_7(%arg0: i32) -> (i32, i32) {
    %c0_i32 = arith.constant 0 : i32
    %c0_i32_0 = arith.constant 0 : i32
    %c0_i32_1 = arith.constant 0 : i32
    return %c0_i32, %c0_i32_0 : i32, i32
  }
  func.func @transform_8(%arg0: i32) -> (i32, i32) {
    %c0_i32 = arith.constant 0 : i32
    %c0_i32_0 = arith.constant 0 : i32
    %c0_i32_1 = arith.constant 0 : i32
    return %c0_i32, %c0_i32_0 : i32, i32
  }
  func.func @transform_9(%arg0: i32) -> (i32, i32, i32) {
    %c0_i32 = arith.constant 0 : i32
    %c0_i32_0 = arith.constant 0 : i32
    %c0_i32_1 = arith.constant 0 : i32
    return %arg0, %c0_i32, %c0_i32_0 : i32, i32, i32
  }
}

</mosaic_0001>

<bundles_post_ra>
// kernel: upblock_forward.1
= control target key start
LH: loop header
LB: loop body
LE: loop exit
PB: predicated region body
PF: predicated region fallthrough
CT: control target
= control target key end

     0   :  { %s2471_s30 = smov 0   ;;  %s3833_s0 = inlined_call_operand.vmem [shape: f32[2,16,256], index: 0, kind: input, shape index: {}]   ;;  %s3834_s1 = inlined_call_operand.vmem [shape: f32[2,8,256], index: 1, kind: input, shape index: {}]   ;;  %s3835_s2 = inlined_call_operand.vmem [shape: s32[2,256], index: 2, kind: input, shape index: {}]   ;;  %s3836_s3 = inlined_call_operand.vmem [shape: f32[8,384], index: 3, kind: input, shape index: {}]   ;;  %s3837_s4 = inlined_call_operand.vmem [shape: f32[8,1], index: 4, kind: input, shape index: {}]   ;;  %s3838_s5 = inlined_call_operand.vmem [shape: f32[8,144], index: 5, kind: input, shape index: {}]   ;;  %s3839_s6 = inlined_call_operand.vmem [shape: f32[8,1], index: 6, kind: input, shape index: {}]   ;;  %s3840_s7 = inlined_call_operand.vmem [shape: f32[8,72], index: 7, kind: input, shape index: {}]   ;;  %s3841_s8 = inlined_call_operand.vmem [shape: f32[8,1], index: 8, kind: input, shape index: {}]   ;;  %s3842_s9 = inlined_call_operand.vmem [shape: f32[2,8,256], index: 9, kind: output, shape index: {}]  }
   0x1 LB: > { %s1626_s10 = sadd.s32 4294967295, %s2393_s30   ;;  %p1630_p0 = scmp.ge.s32.totalorder %s2393_s30, 1  ;;  %s2393_s30 = sphi %s2471_s30, %s19_s30  }
   0x2   : > { %p297_p1 = scmp.lt.s32.totalorder %s2393_s30, 3 }
   0x4   : > { %p298_p2 = pnand %p1630_p0, %p297_p1 }
   0x5   : > { %p338_p3 = scmp.lt.s32.totalorder (!%p298_p2), %s1626_s10, 1  ;;  %v2395_v0 = vmov (!%p298_p2), 0   ;;  %s2396_s15 = smov (!%p298_p2), 112   ;;  %v368_v7 = vlaneseq (!%p298_p2)  ;;  %v2509_v8 = vld [vmem:[%s3835_s2] ss:$2 sm:$0x3] (!%p298_p2) }
   0x6   : > { %301 = sbr.rel (%p298_p2) target bundleno = 1197 (0x4ad), region = 56  ;;  %2271 = vset.pattern.permute.xlu0 (!%p298_p2), %v2395_v0  ;;  %s2397_s16 = smov (!%p298_p2), 111   ;;  %vm3848_vm0 = vcmp.lt.s32.totalorder (!%p298_p2), %v2509_v8, 15  ;;  %v2522_v10 = vld [vmem:[%s3835_s2 + $0x1] ss:$2 sm:$0x3] (!%p298_p2) }
   0x7   : > { %v2517_v9 = vshrl.u32 (!%p298_p2), %v368_v7, 7  ;;  %s2398_s21 = smov (!%p298_p2), 113   ;;  %vm3843_vm1 = vcmp.ge.s32.totalorder (!%p298_p2), %v2522_v10, 1  ;;  %s2399_s22 = smov (!%p298_p2), 114   ;;  %v2541_v12 = vsel (!%p298_p2), %vm3848_vm0, 1, %v2395_v0  ;;  %v3890_v16 = vmov (!%p298_p2), 0 }
   0x8   : > { %vm435_vm2 = vmand (!%p298_p2), %vm3848_vm0, %vm3843_vm1  ;;  %s2400_s23 = smov (!%p298_p2), 115   ;;  %v3892_v17 = vmov (!%p298_p2), 0  ;;  %s2401_s24 = smov (!%p298_p2), 116   ;;  %vm3846_vm6 = vcmp.lt.s32.totalorder (!%p298_p2), %v2522_v10, 15  ;;  %vm3845_vm7 = vcmp.ge.s32.totalorder (!%p298_p2), %v2509_v8, 1  ;;  %v2597_v20 = vsel (!%p298_p2), %vm3843_vm1, 1, %v2395_v0 }
   0x9   : > { %v2536_v11 = vsub.s32 (!%p298_p2), 0, %v2517_v9  ;;  %v2544_v13 = vsel (!%p298_p2), %vm435_vm2, 1, %v2395_v0  ;;  %s2402_s25 = smov (!%p298_p2), 127   ;;  %s2403_s26 = smov (!%p298_p2), 1   ;;  %vm695_vm8 = vmand (!%p298_p2), %vm3845_vm7, %vm3846_vm6  ;;  %v3894_v24 = vmov (!%p298_p2), 0  ;;  %v2631_v26 = vsel (!%p298_p2), %vm3845_vm7, 1, %v2395_v0 }
   0xa   : > { %s2404_s27 = smov (!%p298_p2), 19   ;;  %s2405_s28 = smov (!%p298_p2), 2   ;;  %v2600_v21 = vsel (!%p298_p2), %vm695_vm8, 1, %v2395_v0  ;;  %vm752_vm12 = vmand (!%p298_p2), %vm3845_vm7, %vm3843_vm1  ;;  %v3900_v31 = vmov (!%p298_p2), 0  ;;  %v1030_v32 = vld [vmem:[%s3836_s3 + $0x8] sm:$0xff] (!%p298_p2)  ;;  %v2417_v33 = vmov (!%p298_p2), 0.0  }
   0xb   : > { %v410_v14 = vrot.slane (!%p298_p2), %v2541_v12, %v2536_v11  ;;  %v440_v15 = vrot.slane (!%p298_p2), %v2544_v13, %v2536_v11  ;;  %s2406_s29 = smov (!%p298_p2), 20   ;;  %s2408_s12 = smov (!%p298_p2), 31   ;;  %v586_v22 = vrot.slane (!%p298_p2), %v2597_v20, %v2536_v11  ;;  %v700_v23 = vrot.slane (!%p298_p2), %v2600_v21, %v2536_v11  ;;  %1102 = vmatprep.mubr.f32.mxu0 (!%p298_p2), %v1030_v32  ;;  %v1032_v34 = vld [vmem:[%s3837_s4] sm:$0xff] (!%p298_p2)  ;;  %vm377_vm2 = vmand (!%p298_p2), %vm3848_vm0, %vm3846_vm6 }
   0xc   : > { %s2409_s13 = smov (!%p298_p2), 4   ;;  %s2411_s17 = smov (!%p298_p2), 15   ;;  %v2638_v27 = vsel (!%p298_p2), %vm752_vm12, 1, %v2395_v0  ;;  %v728_v28 = vrot.slane (!%p298_p2), %v2631_v26, %v2536_v11  ;;  %1173 = vmatprep.mubr.f32.mxu1 (!%p298_p2), %v2417_v33  ;;  %v2684_v35 = vsub.s32 (!%p298_p2), 1, %v2517_v9  ;;  %v378_v36 = vsel (!%p298_p2), %vm377_vm2, 1, %v2395_v0 }
   0xd   : > { %s4172_s10 = smov (!%p338_p3, %s1626_s10), 1  ;;  %vm2552_vm3 = vcmp.eq.s32.totalorder %v410_v14, 1  ;;  %vm2556_vm4 = vcmp.eq.s32.totalorder %v440_v15, 1  ;;  %vm2610_vm9 = vcmp.eq.s32.totalorder %v586_v22, 1  ;;  %vm2614_vm10 = vcmp.eq.s32.totalorder %v700_v23, 1  ;;  %s2412_s18 = smov 33  }
   0xe   : > { %s1782_s11 = sshll.u32 %s4172_s10, 5  ;;  %v3891_v16 = vsel %vm2552_vm3, 4294967295, %v3890_v16  ;;  %v3893_v17 = vsel %vm2556_vm4, 4294967295, %v3892_v17  ;;  %v3895_v24 = vsel %vm2610_vm9, 4294967295, %v3894_v24  ;;  %s2413_s19 = smov 16   ;;  %v757_v29 = vrot.slane %v2638_v27, %v2536_v11 }
   0xf   : > { %s342_s14 = scalar_lea.vmem %s3833_s0, %s1782_s11  ;;  %s2407_s11 = smov 3   ;;  %vm2650_vm13 = vcmp.eq.s32.totalorder %v728_v28, 1  ;;  %vm3844_vm8 = vcmp.ge.s32.totalorder %v2522_v10, 2  ;;  %v2689_v37 = vand.u32 127, %v368_v7  ;;  %v386_v40 = vrot.slane %v378_v36, %v2684_v35 }
  0x10   : > { %v2486_v1 = vld [vmem:[%s342_s14] sm:$0xff]  ;;  %v2488_v2 = vld [vmem:[%s342_s14 + $0x10] sm:$0xff]  ;;  %v2490_v3 = vld [vmem:[%s342_s14 + $0x8] sm:$0xff]  ;;  %s2414_s20 = smov 34   ;;  %vm2654_vm14 = vcmp.eq.s32.totalorder %v757_v29, 1  ;;  %v382_v41 = vrot.slane %v378_v36, %v2536_v11  ;;  %v414_v42 = vrot.slane %v2541_v12, %v2684_v35  ;;  %v3902_v45 = vmov 0 }
  0x11   : > { %v2494_v4 = vpack.i.bf16 %v2488_v2, %v2486_v1  ;;  %v2496_v5 = vld [vmem:[%s342_s14 + $0x18] sm:$0xff]  ;;  %v1829_v19 = vpack.c.bf16 %v2488_v2, %v2486_v1  ;;  %s2410_s14 = smov 32   ;;  %v3901_v31 = vsel %vm2654_vm14, 4294967295, %v3900_v31  ;;  %vm465_vm12 = vmand %vm3848_vm0, %vm3844_vm8  ;;  %vm3849_vm5 = vcmp.lt.s32.totalorder %v2689_v37, 112 }
  0x12   : > { %v2504_v6 = vpack.i.bf16 %v2496_v5, %v2490_v3  ;;  %v1827_v18 = vpack.c.bf16 %v2496_v5, %v2490_v3  ;;  %vm3850_vm11 = vcmp.lt.s32.totalorder %v2689_v37, 111  ;;  %vm2702_vm15 = vcmp.eq.s32.totalorder %v386_v40, 1 }
  0x13   : > { %2052 = vrot.lane.b32.xlu1 %v2494_v4, %s2396_s15  ;;  %2042 = vrot.lane.b32.xlu0 %v2494_v4, %s2397_s16  ;;  %v3903_v45 = vsel %vm2702_vm15, 4294967295, %v3902_v45  ;;  %vm2706_vm1 = vcmp.eq.s32.totalorder %v382_v41, 1  ;;  %v3904_v46 = vmov 0  ;;  %v2711_v47 = vsel %vm465_vm12, 1, %v2395_v0 }
  0x14   : > { %v3905_v46 = vsel %vm2706_vm1, 4294967295, %v3904_v46  ;;  %vm3847_vm8 = vcmp.ge.s32.totalorder %v2522_v10, 3  ;;  %vm2715_vm2 = vcmp.eq.s32.totalorder %v414_v42, 1  ;;  %v3906_v55 = vmov 0 }
  0x15   : > { %v3907_v55 = vsel %vm2715_vm2, 4294967295, %v3906_v55  ;;  %v444_v56 = vrot.slane %v2544_v13, %v2684_v35  ;;  %v474_v57 = vrot.slane %v2711_v47, %v2684_v35  ;;  %vm2737_vm6 = vmand %vm3848_vm0, %vm3847_vm8  ;;  %v3910_v23 = vmov 0 }
  0x16   : > { %v470_v29 = vrot.slane %v2711_v47, %v2536_v11  ;;  %vm3915_vm8 = vmpackc.low %vm2702_vm15, %vm2702_vm15  ;;  %vm3916_vm0 = vcmp.ge.s32.totalorder %v2522_v10, 4  ;;  %vm3917_vm12 = vcmp.lt.s32.totalorder %v2509_v8, 15  ;;  %vm3922_vm15 = vcmp.lt.s32.totalorder %v2689_v37, 113 }
  0x17   : > { %2057 = vrot.lane.b32.xlu1 %v2504_v6, %s2396_s15  ;;  %2047 = vrot.lane.b32.xlu0 %v2504_v6, %s2397_s16  ;;  %vm2754_vm7 = vcmp.eq.s32.totalorder %v444_v56, 1  ;;  %vm2778_vm14 = vmand %vm3917_vm12, %vm3916_vm0 }
  0x18   : > { %v3911_v23 = vsel %vm2754_vm7, 4294967295, %v3910_v23  ;;  %vm3924_vm0 = vmpackc.low %vm2706_vm1, %vm2706_vm1 }
  0x19   : > { %vm3925_vm12 = vmpackc.low %vm2715_vm2, %vm2715_vm2  ;;  %vm3952_vm2 = vcmp.lt.s32.totalorder %v2689_v37, 116 }
  0x1b   : > { %2067 = vrot.lane.b32.xlu1 %v2504_v6, %s2398_s21  ;;  %2062 = vrot.lane.b32.xlu0 %v2494_v4, %s2398_s21 }
  0x1f   : > { %2077 = vrot.lane.b32.xlu1 %v2504_v6, %s2399_s22  ;;  %2072 = vrot.lane.b32.xlu0 %v2494_v4, %s2399_s22  ;;  %s2415_s22 = smov 17  }
  0x23   : > { %2087 = vrot.lane.b32.xlu1 %v2504_v6, %s2400_s23  ;;  %2082 = vrot.lane.b32.xlu0 %v2494_v4, %s2400_s23  ;;  %s1783_s23 = sshll.u32 %s4172_s10, 4 }
  0x27   : > { %2097 = vrot.lane.b32.xlu1 %v2504_v6, %s2401_s24  ;;  %2092 = vrot.lane.b32.xlu0 %v2494_v4, %s2401_s24 }
  0x2b   : > { %2107 = vrot.lane.b32.xlu1 %v2504_v6, %s2402_s25  ;;  %2102 = vrot.lane.b32.xlu0 %v2494_v4, %s2402_s25 }
  0x2f   : > { %2117 = vrot.lane.b32.xlu1 %v2504_v6, %s2403_s26  ;;  %2112 = vrot.lane.b32.xlu0 %v2494_v4, %s2403_s26 }
  0x33   : > { %2127 = vrot.lane.b32.xlu1 %v2504_v6, %s2404_s27  ;;  %2122 = vrot.lane.b32.xlu0 %v2494_v4, %s2404_s27  ;;  %s2416_s27 = smov 35  }
  0x37   : > { %2137 = vrot.lane.b32.xlu1 %v2504_v6, %s2405_s28  ;;  %2132 = vrot.lane.b32.xlu0 %v2494_v4, %s2405_s28  ;;  %s2418_s28 = smov 18  }
  0x3b   : > { %2147 = vrot.lane.b32.xlu1 %v2504_v6, %s2406_s29  ;;  %2142 = vrot.lane.b32.xlu0 %v2494_v4, %s2406_s29  ;;  %s2419_s29 = smov 36  }
  0x3f   : > { %2157 = vrot.lane.b32.xlu1 %v2504_v6, %s2407_s11  ;;  %2152 = vrot.lane.b32.xlu0 %v2494_v4, %s2407_s11 }
  0x43   : > { %2167 = vrot.lane.b32.xlu1 %v2504_v6, %s2408_s12  ;;  %2162 = vrot.lane.b32.xlu0 %v2494_v4, %s2408_s12 }
  0x47   : > { %2177 = vrot.lane.b32.xlu1 %v2504_v6, %s2409_s13  ;;  %2172 = vrot.lane.b32.xlu0 %v2494_v4, %s2409_s13 }
  0x4b   : > { %2187 = vrot.lane.b32.xlu1 %v2504_v6, %s2410_s14  ;;  %2182 = vrot.lane.b32.xlu0 %v2494_v4, %s2410_s14 }
  0x4f   : > { %2197 = vrot.lane.b32.xlu1 %v2504_v6, %s2411_s17  ;;  %2192 = vrot.lane.b32.xlu0 %v2494_v4, %s2411_s17 }
  0x53   : > { %2207 = vrot.lane.b32.xlu1 %v2504_v6, %s2412_s18  ;;  %2202 = vrot.lane.b32.xlu0 %v2494_v4, %s2412_s18 }
  0x57   : > { %2217 = vrot.lane.b32.xlu1 %v2504_v6, %s2413_s19  ;;  %2212 = vrot.lane.b32.xlu0 %v2494_v4, %s2413_s19 }
  0x5b   : > { %2227 = vrot.lane.b32.xlu1 %v2504_v6, %s2414_s20  ;;  %2222 = vrot.lane.b32.xlu0 %v2494_v4, %s2414_s20 }
  0x5f   : > { %2237 = vrot.lane.b32.xlu1 %v2504_v6, %s2415_s22  ;;  %2232 = vrot.lane.b32.xlu0 %v2494_v4, %s2415_s22 }
  0x63   : > { %2247 = vrot.lane.b32.xlu1 %v2504_v6, %s2416_s27  ;;  %2242 = vrot.lane.b32.xlu0 %v2494_v4, %s2416_s27 }
  0x67   : > { %2257 = vrot.lane.b32.xlu1 %v2504_v6, %s2418_s28  ;;  %2252 = vrot.lane.b32.xlu0 %v2494_v4, %s2418_s28  ;;  %s347_s28 = scalar_lea.vmem %s3834_s1, %s1783_s23 }
  0x6b   : > { %2267 = vrot.lane.b32.xlu1 %v2504_v6, %s2419_s29  ;;  %2262 = vrot.lane.b32.xlu0 %v2494_v4, %s2419_s29 }
  0x6f   : > { %1035 = vperm.xlu0 %2271, %v1032_v34  }
  0x85   : > { %v2053_v38 = vpop.permute.xlu1 %2052  ;;  %v2043_v39 = vpop.permute.xlu0 %2042 }
  0x86   : > { %v2054_v51 = vunpack.i.l.bf16 %v2053_v38  ;;  %v2045_v52 = vunpack.i.h.bf16 %v2043_v39  ;;  %v2044_v53 = vunpack.i.l.bf16 %v2043_v39  ;;  %v2055_v58 = vunpack.i.h.bf16 %v2053_v38 }
  0x87   : > { %v496_v39 = vsel %vm2737_vm6, 1, %v2395_v0  ;;  %vm3923_vm6 = vmmov %vm3922_vm15 }
  0x89   : > { %v2058_v43 = vpop.permute.xlu1 %2057  ;;  %v2048_v44 = vpop.permute.xlu0 %2047 }
  0x8a   : > { %v2059_v48 = vunpack.i.l.bf16 %v2058_v43  ;;  %v2050_v49 = vunpack.i.h.bf16 %v2048_v44  ;;  %v2049_v50 = vunpack.i.l.bf16 %v2048_v44  ;;  %v2060_v54 = vunpack.i.h.bf16 %v2058_v43 }
  0x8c   : > { %v404_v59 = vsel %vm3849_vm5, %v2059_v48, %v2054_v51  ;;  %v373_v62 = vsel %vm3850_vm11, %v2049_v50, %v2044_v53  ;;  %v374_v63 = vsel %vm3850_vm11, %v2050_v49, %v2045_v52  ;;  %v405_v13 = vsel %vm3849_vm5, %v2060_v54, %v2055_v58 }
  0x8d   : > { %v2068_v60 = vpop.permute.xlu1 %2067  ;;  %v2063_v61 = vpop.permute.xlu0 %2062  ;;  %v1785_v14 = vpack.c.bf16 %v374_v63, %v373_v62  ;;  %v371_v15 = vsel %vm3850_vm11, %v2044_v53, %v2049_v50  ;;  %v372_v22 = vsel %vm3850_vm11, %v2045_v52, %v2050_v49  ;;  %vm2758_vm5 = vcmp.eq.s32.totalorder %v474_v57, 1 }
  0x8e   : > { %v2070_v4 = vunpack.i.h.bf16 %v2068_v60  ;;  %v2069_v6 = vunpack.i.l.bf16 %v2068_v60  ;;  %v2065_v7 = vunpack.i.h.bf16 %v2063_v61  ;;  %v2064_v9 = vunpack.i.l.bf16 %v2063_v61 }
  0x8f   : > { %vm3914_vm11 = vcmp.lt.s32.totalorder %v2689_v37, 112  ;;  %1787 = vmatprep.subr.msk.bf16.mxu0 %vm3915_vm8, %v1785_v14  ;;  %v1788_v34 = vpack.c.bf16 %v372_v22, %v371_v15  ;;  %vm3921_vm8 = vcmp.lt.s32.totalorder %v2689_v37, 112  ;;  %v1791_v43 = vpack.c.bf16 %v405_v13, %v404_v59 }
  0x90   : > { %v402_v32 = vsel %vm3914_vm11, %v2054_v51, %v2059_v48  ;;  %vm3920_vm11 = vcmp.lt.s32.totalorder %v2522_v10, 15  ;;  %v403_v42 = vsel %vm3921_vm8, %v2055_v58, %v2060_v54  ;;  %v433_v44 = vsel %vm3922_vm15, %v2070_v4, %v2065_v7  ;;  %vm3855_vm15 = vmpackc.low %vm2552_vm3, %vm2552_vm3 }
  0x91   : > { %v2078_v36 = vpop.permute.xlu1 %2077  ;;  %v2073_v38 = vpop.permute.xlu0 %2072  ;;  %v554_v41 = vsel %vm3920_vm11, 1, %v2395_v0  ;;  %v432_v47 = vsel %vm3923_vm6, %v2069_v6, %v2064_v9  ;;  %1790 = vmatpush1.bf16.msk.msra.mxu0 %vm3924_vm0, %v1788_v34  ;;  %v504_v52 = vrot.slane %v496_v39, %v2684_v35  ;;  %v500_v53 = vrot.slane %v496_v39, %v2536_v11  ;;  %vm3926_vm8 = vmmov %vm3923_vm6 }
  0x92   : > { %v2080_v48 = vunpack.i.h.bf16 %v2078_v36  ;;  %v2079_v49 = vunpack.i.l.bf16 %v2078_v36  ;;  %v2075_v50 = vunpack.i.h.bf16 %v2073_v38  ;;  %v2074_v51 = vunpack.i.l.bf16 %v2073_v38  ;;  %1793 = vmatprep.subr.msk.bf16.mxu0 %vm3925_vm12, %v1791_v43 }
  0x93   : > { %v2810_v54 = vsel %vm2778_vm14, 1, %v2395_v0  ;;  %v562_v56 = vrot.slane %v554_v41, %v2684_v35  ;;  %v1794_v57 = vpack.c.bf16 %v403_v42, %v402_v32  ;;  %v431_v58 = vsel %vm3926_vm8, %v2065_v7, %v2070_v4 }
  0x94   : > { %v430_v59 = vsel %vm3923_vm6, %v2064_v9, %v2069_v6  ;;  %v1797_v60 = vpack.c.bf16 %v433_v44, %v432_v47  ;;  %vm3927_vm14 = vcmp.ge.s32.totalorder %v2522_v10, 3  ;;  %vm3928_vm12 = vcmp.ge.s32.totalorder %v2509_v8, 1 }
  0x95   : > { %v2088_v61 = vpop.permute.xlu1 %2087  ;;  %v2083_v62 = vpop.permute.xlu0 %2082  ;;  %vm2824_vm11 = vmand %vm3928_vm12, %vm3927_vm14  ;;  %vm3931_vm8 = vcmp.lt.s32.totalorder %v2689_v37, 114  ;;  %1796 = vmatpush1.bf16.msk.msra.mxu0 %vm3855_vm15, %v1794_v57  ;;  %vm2837_vm0 = vcmp.eq.s32.totalorder %v470_v29, 1  ;;  %v534_v22 = vrot.slane %v2810_v54, %v2684_v35  ;;  %v530_v29 = vrot.slane %v2810_v54, %v2536_v11 }
  0x96   : > { %v2090_v63 = vunpack.i.h.bf16 %v2088_v61  ;;  %v2089_v12 = vunpack.i.l.bf16 %v2088_v61  ;;  %v2085_v13 = vunpack.i.h.bf16 %v2083_v62  ;;  %v2084_v14 = vunpack.i.l.bf16 %v2083_v62  ;;  %vm3932_vm6 = vmmov %vm3931_vm8 }
  0x97   : > { %v463_v6 = vsel %vm3931_vm8, %v2080_v48, %v2075_v50  ;;  %v462_v7 = vsel %vm3932_vm6, %v2079_v49, %v2074_v51  ;;  %vm3935_vm12 = vmpackc.low %vm2754_vm7, %vm2754_vm7  ;;  %vm2850_vm6 = vcmp.eq.s32.totalorder %v504_v52, 1  ;;  %v558_v32 = vrot.slane %v554_v41, %v2536_v11 }
  0x98   : > { %1799 = vmatprep.subr.msk.bf16.mxu0 %vm3935_vm12, %v1797_v60  ;;  %v1800_v34 = vpack.c.bf16 %v431_v58, %v430_v59  ;;  %vm3938_vm15 = vmmov %vm3931_vm8  ;;  %vm2864_vm14 = vcmp.eq.s32.totalorder %v500_v53, 1  ;;  %v811_v42 = vsel %vm2824_vm11, 1, %v2395_v0  ;;  %v460_v41 = vsel %vm3931_vm8, %v2074_v51, %v2079_v49 }
  0x99   : > { %v461_v36 = vsel %vm3938_vm15, %v2075_v50, %v2080_v48  ;;  %v2098_v38 = vpop.permute.xlu1 %2097  ;;  %v2093_v39 = vpop.permute.xlu0 %2092  ;;  %vm1804_vm12 = vmpackc.low %vm2758_vm5, %vm2758_vm5  ;;  %v1803_v43 = vpack.c.bf16 %v463_v6, %v462_v7  ;;  %vm3941_vm15 = vcmp.lt.s32.totalorder %v2689_v37, 115  ;;  %vm2877_vm3 = vcmp.eq.s32.totalorder %v562_v56, 1 }
  0x9a   : > { %v493_v44 = vsel %vm3941_vm15, %v2090_v63, %v2085_v13  ;;  %vm3942_vm1 = vmmov %vm3941_vm15  ;;  %v3943_v47 = vmov 0  ;;  %v2100_v48 = vunpack.i.h.bf16 %v2098_v38  ;;  %v2099_v50 = vunpack.i.l.bf16 %v2098_v38 }
  0x9b   : > { %v492_v28 = vsel %vm3942_vm1, %v2089_v12, %v2084_v14  ;;  %v3944_v47 = vsel %vm2877_vm3, 4294967295, %v3943_v47  ;;  %vm3945_vm5 = vmpackc.low %vm2556_vm4, %vm2556_vm4  ;;  %v2095_v49 = vunpack.i.h.bf16 %v2093_v39  ;;  %v2094_v51 = vunpack.i.l.bf16 %v2093_v39 }
  0x9c   : > { %1802 = vmatpush1.bf16.msk.msra.mxu0 %vm3945_vm5, %v1800_v34  ;;  %vm2889_vm1 = vcmp.eq.s32.totalorder %v534_v22, 1  ;;  %vm2893_vm8 = vcmp.eq.s32.totalorder %v558_v32, 1  ;;  %v3948_v53 = vmov 0  ;;  %v819_v54 = vrot.slane %v811_v42, %v2684_v35  ;;  %vm1810_vm5 = vmpackc.low %vm2850_vm6, %vm2850_vm6 }
  0x9d   : > { %1805 = vmatprep.subr.msk.bf16.mxu0 %vm1804_vm12, %v1803_v43  ;;  %v3949_v53 = vsel %vm2893_vm8, 4294967295, %v3948_v53  ;;  %v815_v56 = vrot.slane %v811_v42, %v2536_v11  ;;  %v590_v57 = vrot.slane %v2597_v20, %v2684_v35  ;;  %v1806_v58 = vpack.c.bf16 %v461_v36, %v460_v41  ;;  %vm3950_vm12 = vmmov %vm3941_vm15  ;;  %v2108_v62 = vpop.permute.xlu1 %2107  ;;  %v2103_v4 = vpop.permute.xlu0 %2102 }
  0x9e   : > { %v491_v59 = vsel %vm3950_vm12, %v2085_v13, %v2090_v63  ;;  %vm3951_vm15 = vmmov %vm3950_vm12  ;;  %v1809_v61 = vpack.c.bf16 %v493_v44, %v492_v28  ;;  %v2110_v6 = vunpack.i.h.bf16 %v2108_v62  ;;  %v2109_v7 = vunpack.i.l.bf16 %v2108_v62 }
  0x9f   : > { %v490_v60 = vsel %vm3951_vm15, %v2084_v14, %v2089_v12  ;;  %v2105_v22 = vunpack.i.h.bf16 %v2103_v4  ;;  %v2104_v32 = vunpack.i.l.bf16 %v2103_v4  ;;  %v523_v20 = vsel %vm3952_vm2, %v2100_v48, %v2095_v49  ;;  %vm3953_vm12 = vmmov %vm3952_vm2 }
  0xa0   : > { %v522_v63 = vsel %vm3953_vm12, %v2099_v50, %v2094_v51  ;;  %vm3954_vm15 = vmpackc.low %vm2837_vm0, %vm2837_vm0  ;;  %vm2921_vm4 = vcmp.eq.s32.totalorder %v530_v29, 1  ;;  %v1812_v13 = vpack.c.bf16 %v491_v59, %v490_v60  ;;  %vm3957_vm2 = vcmp.ge.s32.totalorder %v2522_v10, 2 }
  0xa1   : > { %1808 = vmatpush1.bf16.msk.msra.mxu0 %vm3954_vm15, %v1806_v58  ;;  %v2929_v14 = vsel %vm3957_vm2, 1, %v2395_v0  ;;  %vm3958_vm0 = vcmp.ge.s32.totalorder %v2522_v10, 4  ;;  %vm3959_vm12 = vcmp.ge.s32.totalorder %v2509_v8, 1  ;;  %vm3962_vm6 = vcmp.ge.s32.totalorder %v2522_v10, 3  ;;  %v2953_v39 = vpop.permute.xlu1 %2117  ;;  %v2955_v42 = vpop.permute.xlu0 %2112 }
  0xa2   : > { %1811 = vmatprep.subr.msk.bf16.mxu0 %vm1810_vm5, %v1809_v61  ;;  %vm2935_vm15 = vmand %vm3959_vm12, %vm3958_vm0  ;;  %v2942_v15 = vsel %vm3962_vm6, 1, %v2395_v0  ;;  %vm3866_vm5 = vcmp.ge.s32.totalorder %v2509_v8, 2  ;;  %vm3963_vm11 = vcmp.lt.s32.totalorder %v2689_v37, 116  ;;  %vm3965_vm7 = vcmp.lt.s32.totalorder %v2689_v37, 127 }
  0xa3   : > { %v521_v29 = vsel %vm3963_vm11, %v2095_v49, %v2100_v48  ;;  %vm3964_vm2 = vmmov %vm3963_vm11  ;;  %v553_v36 = vsel %vm3965_vm7, %v2110_v6, %v2105_v22  ;;  %v1815_v41 = vpack.c.bf16 %v523_v20, %v522_v63  ;;  %vm2961_vm12 = vcmp.eq.s32.totalorder %v819_v54, 1 }
  0xa4   : > { %v520_v34 = vsel %vm3964_vm2, %v2094_v51, %v2099_v50  ;;  %vm3966_vm0 = vmmov %vm3965_vm7  ;;  %vm2965_vm2 = vcmp.eq.s32.totalorder %v815_v56, 1  ;;  %vm2969_vm7 = vcmp.eq.s32.totalorder %v590_v57, 1  ;;  %v3971_v28 = vmov 0 }
  0xa5   : > { %v552_v38 = vsel %vm3966_vm0, %v2109_v7, %v2104_v32  ;;  %vm1816_vm6 = vmpackc.low %vm2889_vm1, %vm2889_vm1  ;;  %v3972_v28 = vsel %vm2969_vm7, 4294967295, %v3971_v28  ;;  %v618_v48 = vrot.slane %v2929_v14, %v2684_v35  ;;  %v840_v50 = vsel %vm2935_vm15, 1, %v2395_v0  ;;  %v2128_v4 = vpop.permute.xlu1 %2127  ;;  %v2123_v52 = vpop.permute.xlu0 %2122 }
  0xa6   : > { %vm3973_vm0 = vmpackc.low %vm2864_vm14, %vm2864_vm14  ;;  %v614_v49 = vrot.slane %v2929_v14, %v2536_v11  ;;  %v646_v51 = vrot.slane %v2942_v15, %v2684_v35  ;;  %v1818_v40 = vpack.c.bf16 %v521_v29, %v520_v34  ;;  %vm3974_vm14 = vcmp.lt.s32.totalorder %v2689_v37, 127 }
  0xa7   : > { %1814 = vmatpush1.bf16.msk.msra.mxu0 %vm3973_vm0, %v1812_v13  ;;  %v551_v54 = vsel %vm3974_vm14, %v2105_v22, %v2110_v6  ;;  %vm3975_vm0 = vmmov %vm3974_vm14  ;;  %v1821_v57 = vpack.c.bf16 %v553_v36, %v552_v38  ;;  %vm3976_vm15 = vcmp.lt.s32.totalorder %v2522_v10, 15  ;;  %v2120_v59 = vunpack.i.h.bf16 %v2953_v39 }
  0xa8   : > { %v550_v56 = vsel %vm3975_vm0, %v2104_v32, %v2109_v7  ;;  %1817 = vmatprep.subr.msk.bf16.mxu0 %vm1816_vm6, %v1815_v41  ;;  %vm3003_vm11 = vmand %vm3866_vm5, %vm3976_vm15  ;;  %v2119_v60 = vunpack.i.l.bf16 %v2953_v39  ;;  %v2115_v61 = vunpack.i.h.bf16 %v2955_v42  ;;  %v2114_v62 = vunpack.i.l.bf16 %v2955_v42 }
  0xa9   : > { %vm3867_vm1 = vmpackc.low %vm2877_vm3, %vm2877_vm3  ;;  %v2130_v6 = vunpack.i.h.bf16 %v2128_v4  ;;  %v2129_v7 = vunpack.i.l.bf16 %v2128_v4  ;;  %v2125_v22 = vunpack.i.h.bf16 %v2123_v52  ;;  %v2124_v32 = vunpack.i.l.bf16 %v2123_v52  ;;  %v2138_v39 = vpop.permute.xlu1 %2137  ;;  %v2133_v42 = vpop.permute.xlu0 %2132 }
  0xaa   : > { %v1824_v20 = vpack.c.bf16 %v551_v54, %v550_v56  ;;  %vm3979_vm14 = vmpackc.low %vm2921_vm4, %vm2921_vm4  ;;  %v848_v63 = vrot.slane %v840_v50, %v2684_v35  ;;  %v844_v13 = vrot.slane %v840_v50, %v2536_v11  ;;  %v3028_v14 = vsel %vm3003_vm11, 1, %v2395_v0 }
  0xab   : > { %1820 = vmatpush1.bf16.msk.msra.mxu0 %vm3979_vm14, %v1818_v40  ;;  %vm3868_vm0 = vmpackc.low %vm2893_vm8, %vm2893_vm8  ;;  %vm3980_vm4 = vcmp.lt.s32.totalorder %v2689_v37, 19  ;;  %vm3984_vm6 = vcmp.lt.s32.totalorder %v2689_v37, 1  ;;  %v2140_v40 = vunpack.i.h.bf16 %v2138_v39  ;;  %v2139_v54 = vunpack.i.l.bf16 %v2138_v39 }
  0xac   : > { %1823 = vmatprep.subr.msk.bf16.mxu0 %vm3867_vm1, %v1821_v57  ;;  %v806_v12 = vsel %vm3980_vm4, %v2124_v32, %v2129_v7  ;;  %vm3981_vm15 = vmmov %vm3980_vm4  ;;  %v579_v36 = vsel %vm3984_vm6, %v2115_v61, %v2120_v59  ;;  %v2135_v56 = vunpack.i.h.bf16 %v2133_v42  ;;  %v2134_v57 = vunpack.i.l.bf16 %v2133_v42 }
  0xad   : > { %v807_v9 = vsel %vm3981_vm15, %v2125_v22, %v2130_v6  ;;  %vm1880_vm14 = vmpackc.low %vm2961_vm12, %vm2961_vm12  ;;  %v642_v52 = vrot.slane %v2942_v15, %v2536_v11  ;;  %vm3992_vm15 = vcmp.lt.s32.totalorder %v2689_v37, 1  ;;  %v878_v3 = vrot.slane %v3028_v14, %v2684_v35 }
  0xae   : > { %vm3982_vm5 = vmmov %vm3980_vm4  ;;  %v1879_v41 = vpack.c.bf16 %v807_v9, %v806_v12  ;;  %v581_v43 = vsel %vm3992_vm15, %v2120_v59, %v2115_v61  ;;  %v2143_v61 = vpop.permute.xlu0 %2142 }
  0xaf   : > { %v808_v29 = vsel %vm3982_vm5, %v2129_v7, %v2124_v32  ;;  %vm3983_vm11 = vmmov %vm3980_vm4  ;;  %1826 = vmatpush1.bf16.msk.msra.mxu0 %vm3868_vm0, %v1824_v20  ;;  %vm3998_vm0 = vcmp.lt.s32.totalorder %v2689_v37, 2  ;;  %v2144_v7 = vunpack.i.l.bf16 %v2143_v61  ;;  %v874_v20 = vrot.slane %v3028_v14, %v2536_v11 }
  0xb0   : > { %v809_v34 = vsel %vm3983_vm11, %v2130_v6, %v2125_v22  ;;  %vm3985_vm1 = vmmov %vm3984_vm6  ;;  %1881 = vmatprep.subr.msk.bf16.mxu1 %vm1880_vm14, %v1879_v41  ;;  %vm3068_vm6 = vcmp.eq.s32.totalorder %v614_v49, 1  ;;  %1828 = vmatprep.subr.bf16.mxu0 %v1827_v18  ;;  %vm3085_vm14 = vcmp.eq.s32.totalorder %v848_v63, 1  ;;  %vm3089_vm11 = vcmp.eq.s32.totalorder %v844_v13, 1 }
  0xb1   : > { %v578_v38 = vsel %vm3985_vm1, %v2114_v62, %v2119_v60  ;;  %v1882_v50 = vpack.c.bf16 %v809_v34, %v808_v29  ;;  %vm1883_vm5 = vmpackc.low %vm2965_vm2, %vm2965_vm2  ;;  %vm3064_vm1 = vcmp.eq.s32.totalorder %v618_v48, 1  ;;  %vm3072_vm2 = vcmp.eq.s32.totalorder %v646_v51, 1 }
  0xb2   : > { %vm3993_vm12 = vmmov %vm3992_vm15  ;;  %v1831_v6 = vpack.c.bf16 %v579_v36, %v578_v38  ;;  %v607_v15 = vsel %vm3998_vm0, %v2135_v56, %v2140_v40  ;;  %v609_v32 = vsel %vm3998_vm0, %v2140_v40, %v2135_v56  ;;  %vm4001_vm4 = vcmp.lt.s32.totalorder %v2689_v37, 20  ;;  %v2153_v36 = vpop.permute.xlu0 %2152 }
  0xb3   : > { %v580_v48 = vsel %vm3993_vm12, %v2119_v60, %v2114_v62  ;;  %vm3999_vm15 = vmmov %vm3998_vm0  ;;  %1884 = vmatpush1.bf16.msk.msra.mxu1 %vm1883_vm5, %v1882_v50  ;;  %v2148_v60 = vpop.permute.xlu1 %2147  ;;  %v2145_v62 = vunpack.i.h.bf16 %v2143_v61  ;;  %1830 = vmatpush1.bf16.msra.mxu0 %v1829_v19  ;;  %v2155_v42 = vunpack.i.h.bf16 %v2153_v36  ;;  %v2154_v41 = vunpack.i.l.bf16 %v2153_v36 }
  0xb4   : > { %v606_v59 = vsel %vm3999_vm15, %v2134_v57, %v2139_v54  ;;  %v2150_v5 = vunpack.i.h.bf16 %v2148_v60  ;;  %v2149_v18 = vunpack.i.l.bf16 %v2148_v60  ;;  %v1834_v22 = vpack.c.bf16 %v581_v43, %v580_v48  ;;  %vm4002_vm0 = vmmov %vm4001_vm4 }
  0xb5   : > { %vm4000_vm15 = vcmp.ge.s32.totalorder %v2522_v10, 4  ;;  %vm4003_vm12 = vmmov %vm4002_vm0  ;;  %v1837_v14 = vpack.c.bf16 %v607_v15, %v606_v59 }
  0xb6   : > { %v666_v63 = vsel %vm4000_vm15, 1, %v2395_v0  ;;  %v836_v13 = vsel %vm4001_vm4, %v2145_v62, %v2150_v5  ;;  %v838_v12 = vsel %vm4002_vm0, %v2150_v5, %v2145_v62  ;;  %v835_v1 = vsel %vm4003_vm12, %v2144_v7, %v2149_v18  ;;  %vm4004_vm8 = vmmov %vm4002_vm0  ;;  %v2163_v15 = vpop.permute.xlu0 %2162 }
  0xb7   : > { %v837_v2 = vsel %vm4004_vm8, %v2149_v18, %v2144_v7  ;;  %vm4005_vm5 = vmpackc.low %vm2969_vm7, %vm2969_vm7  ;;  %vm4006_vm4 = vcmp.lt.s32.totalorder %v2689_v37, 2  ;;  %v1885_v9 = vpack.c.bf16 %v836_v13, %v835_v1  ;;  %v2158_v34 = vpop.permute.xlu1 %2157  ;;  %vm3149_vm0 = vcmp.eq.s32.totalorder %v878_v3, 1 }
  0xb8   : > { %1833 = vmatprep.subr.msk.bf16.mxu0 %vm4005_vm5, %v1831_v6  ;;  %vm1886_vm15 = vmpackc.low %vm3085_vm14, %vm3085_vm14  ;;  %v608_v19 = vsel %vm4006_vm4, %v2139_v54, %v2134_v57  ;;  %v1888_v29 = vpack.c.bf16 %v838_v12, %v837_v2  ;;  %v2160_v38 = vunpack.i.h.bf16 %v2158_v34  ;;  %v2159_v39 = vunpack.i.l.bf16 %v2158_v34 }
  0xb9   : > { %vm1889_vm14 = vmpackc.low %vm3089_vm11, %vm3089_vm11  ;;  %1887 = vmatprep.subr.msk.bf16.mxu1 %vm1886_vm15, %v1885_v9  ;;  %vm3145_vm5 = vcmp.eq.s32.totalorder %v642_v52, 1  ;;  %v674_v54 = vrot.slane %v666_v63, %v2684_v35  ;;  %vm4012_vm11 = vcmp.ge.s32.totalorder %v2509_v8, 2  ;;  %vm4013_vm4 = vcmp.lt.s32.totalorder %v2689_v37, 3 }
  0xba   : > { %vm4007_vm12 = vmpackc.low %vm2610_vm9, %vm2610_vm9  ;;  %v898_v56 = vsel %vm4012_vm11, 1, %v2395_v0  ;;  %v635_v57 = vsel %vm4013_vm4, %v2155_v42, %v2160_v38  ;;  %v1840_v49 = vpack.c.bf16 %v609_v32, %v608_v19  ;;  %1890 = vmatpush1.bf16.msk.msra.mxu1 %vm1889_vm14, %v1888_v29  ;;  %v670_v58 = vrot.slane %v666_v63, %v2536_v11  ;;  %v2173_v2 = vpop.permute.xlu0 %2172 }
  0xbb   : > { %1836 = vmatpush1.bf16.msk.msra.mxu0 %vm4007_vm12, %v1834_v22  ;;  %vm4014_vm12 = vmmov %vm4013_vm4  ;;  %v2168_v6 = vpop.permute.xlu1 %2167  ;;  %v2165_v44 = vunpack.i.h.bf16 %v2163_v15  ;;  %v2164_v3 = vunpack.i.l.bf16 %v2163_v15  ;;  %vm3188_vm14 = vcmp.eq.s32.totalorder %v674_v54, 1  ;;  %v906_v62 = vrot.slane %v898_v56, %v2684_v35 }
  0xbc   : > { %v637_v43 = vsel %vm4014_vm12, %v2160_v38, %v2155_v42  ;;  %vm4015_vm15 = vmmov %vm4013_vm4  ;;  %v2170_v60 = vunpack.i.h.bf16 %v2168_v6  ;;  %v2169_v61 = vunpack.i.l.bf16 %v2168_v6  ;;  %vm4022_vm12 = vcmp.lt.s32.totalorder %v2689_v37, 31 }
  0xbd   : > { %v634_v52 = vsel %vm4015_vm15, %v2154_v41, %v2159_v39  ;;  %vm4016_vm8 = vmmov %vm4013_vm4  ;;  %v902_v19 = vrot.slane %v898_v56, %v2536_v11  ;;  %v2175_v29 = vunpack.i.h.bf16 %v2173_v2  ;;  %v2174_v34 = vunpack.i.l.bf16 %v2173_v2 }
  0xbe   : > { %v636_v48 = vsel %vm4016_vm8, %v2159_v39, %v2154_v41  ;;  %vm4017_vm3 = vmpackc.low %vm3064_vm1, %vm3064_vm1  ;;  %v1843_v51 = vpack.c.bf16 %v635_v57, %v634_v52  ;;  %vm3176_vm8 = vcmp.eq.s32.totalorder %v874_v20, 1  ;;  %v865_v7 = vsel %vm4022_vm12, %v2165_v44, %v2170_v60  ;;  %v2183_v57 = vpop.permute.xlu0 %2182 }
  0xbf   : > { %1839 = vmatprep.subr.msk.bf16.mxu0 %vm4017_vm3, %v1837_v14  ;;  %vm1841_vm11 = vmpackc.low %vm3068_vm6, %vm3068_vm6  ;;  %v1846_v5 = vpack.c.bf16 %v637_v43, %v636_v48  ;;  %vm4026_vm6 = vcmp.ge.s32.totalorder %v2522_v10, 1  ;;  %vm4027_vm3 = vcmp.ge.s32.totalorder %v2509_v8, 2  ;;  %v2178_v1 = vpop.permute.xlu1 %2177  ;;  %v704_v52 = vrot.slane %v2600_v21, %v2684_v35 }
  0xc0   : > { %vm1844_vm4 = vmpackc.low %vm3072_vm2, %vm3072_vm2  ;;  %1842 = vmatpush1.bf16.msk.msra.mxu0 %vm1841_vm11, %v1840_v49  ;;  %v2180_v14 = vunpack.i.h.bf16 %v2178_v1  ;;  %v2179_v9 = vunpack.i.l.bf16 %v2178_v1  ;;  %v2184_v6 = vunpack.i.l.bf16 %v2183_v57 }
  0xc1   : > { %vm4023_vm15 = vmmov %vm4022_vm12  ;;  %1845 = vmatprep.subr.msk.bf16.mxu0 %vm1844_vm4, %v1843_v51  ;;  %v2185_v51 = vunpack.i.h.bf16 %v2183_v57 }
  0xc2   : > { %v867_v22 = vsel %vm4023_vm15, %v2170_v60, %v2165_v44  ;;  %vm4024_vm11 = vmmov %vm4022_vm12  ;;  %vm3217_vm15 = vcmp.eq.s32.totalorder %v670_v58, 1 }
  0xc3   : > { %v864_v32 = vsel %vm4024_vm11, %v2164_v3, %v2169_v61  ;;  %vm4025_vm1 = vmmov %vm4024_vm11  ;;  %vm4036_vm11 = vcmp.lt.s32.totalorder %v2689_v37, 4  ;;  %v2188_v56 = vpop.permute.xlu1 %2187 }
  0xc4   : > { %v866_v20 = vsel %vm4025_vm1, %v2169_v61, %v2164_v3  ;;  %vm3210_vm12 = vmand %vm4027_vm3, %vm4026_vm6  ;;  %v1891_v13 = vpack.c.bf16 %v865_v7, %v864_v32  ;;  %vm893_vm3 = vcmp.lt.s32.totalorder %v2689_v37, 32  ;;  %vm3233_vm6 = vcmp.eq.s32.totalorder %v906_v62, 1 }
  0xc5   : > { %v1894_v12 = vpack.c.bf16 %v867_v22, %v866_v20  ;;  %vm1895_vm1 = vmpackc.low %vm3176_vm8, %vm3176_vm8  ;;  %v927_v38 = vsel %vm3210_vm12, 1, %v2395_v0  ;;  %v663_v39 = vsel %vm4036_vm11, %v2175_v29, %v2180_v14  ;;  %v2190_v48 = vunpack.i.h.bf16 %v2188_v56 }
  0xc6   : > { %vm4032_vm2 = vmpackc.low %vm3145_vm5, %vm3145_vm5  ;;  %v2189_v49 = vunpack.i.l.bf16 %v2188_v56  ;;  %vm3875_vm8 = vcmp.lt.s32.totalorder %v2689_v37, 15  ;;  %v935_v15 = vrot.slane %v927_v38, %v2684_v35  ;;  %v931_v62 = vrot.slane %v927_v38, %v2536_v11 }
  0xc7   : > { %1848 = vmatpush1.bf16.msk.msra.mxu0 %vm4032_vm2, %v1846_v5  ;;  %vm4033_vm4 = vmpackc.low %vm3149_vm0, %vm3149_vm0  ;;  %v895_v59 = vsel %vm893_vm3, %v2185_v51, %v2190_v48  ;;  %v897_v58 = vsel %vm893_vm3, %v2190_v48, %v2185_v51  ;;  %v2198_v3 = vpop.permute.xlu1 %2197  ;;  %v2193_v5 = vpop.permute.xlu0 %2192 }
  0xc8   : > { %1893 = vmatprep.subr.msk.bf16.mxu1 %vm4033_vm4, %v1891_v13  ;;  %vm4037_vm5 = vmmov %vm4036_vm11  ;;  %vm3259_vm11 = vcmp.eq.s32.totalorder %v902_v19, 1  ;;  %v894_v21 = vsel %vm893_vm3, %v2184_v6, %v2189_v49  ;;  %v896_v60 = vsel %vm893_vm3, %v2189_v49, %v2184_v6  ;;  %v2200_v7 = vunpack.i.h.bf16 %v2198_v3 }
  0xc9   : > { %v665_v42 = vsel %vm4037_vm5, %v2180_v14, %v2175_v29  ;;  %vm4038_vm2 = vmmov %vm4037_vm5  ;;  %1896 = vmatpush1.bf16.msk.msra.mxu1 %vm1895_vm1, %v1894_v12  ;;  %vm4042_vm1 = vcmp.ge.s32.totalorder %v2522_v10, 2  ;;  %v1897_v61 = vpack.c.bf16 %v895_v59, %v894_v21  ;;  %v1900_v44 = vpack.c.bf16 %v897_v58, %v896_v60 }
  0xca   : > { %v662_v41 = vsel %vm4038_vm2, %v2174_v34, %v2179_v9  ;;  %vm4039_vm0 = vmmov %vm4038_vm2  ;;  %v2199_v22 = vunpack.i.l.bf16 %v2198_v3  ;;  %v2195_v32 = vunpack.i.h.bf16 %v2193_v5  ;;  %v2194_v20 = vunpack.i.l.bf16 %v2193_v5 }
  0xcb   : > { %v664_v50 = vsel %vm4039_vm0, %v2179_v9, %v2174_v34  ;;  %vm1850_vm12 = vmpackc.low %vm3188_vm14, %vm3188_vm14  ;;  %v1849_v40 = vpack.c.bf16 %v663_v39, %v662_v41  ;;  %vm3285_vm0 = vcmp.eq.s32.totalorder %v704_v52, 1  ;;  %vm3295_vm3 = vcmp.eq.s32.totalorder %v935_v15, 1  ;;  %v2208_v9 = vpop.permute.xlu1 %2207  ;;  %v2203_v29 = vpop.permute.xlu0 %2202 }
  0xcc   : > { %v1852_v54 = vpack.c.bf16 %v665_v42, %v664_v50  ;;  %vm1853_vm4 = vmpackc.low %vm3217_vm15, %vm3217_vm15  ;;  %vm4043_vm15 = vcmp.ge.s32.totalorder %v2509_v8, 2  ;;  %v732_v13 = vrot.slane %v2631_v26, %v2684_v35  ;;  %v691_v1 = vsel %vm3875_vm8, %v2195_v32, %v2200_v7 }
  0xcd   : > { %1851 = vmatprep.subr.msk.bf16.mxu0 %vm1850_vm12, %v1849_v40  ;;  %vm1898_vm14 = vmpackc.low %vm3233_vm6, %vm3233_vm6  ;;  %v693_v2 = vsel %vm3875_vm8, %v2200_v7, %v2195_v32  ;;  %v690_v4 = vsel %vm3875_vm8, %v2194_v20, %v2199_v22  ;;  %v692_v19 = vsel %vm3875_vm8, %v2199_v22, %v2194_v20  ;;  %vm921_vm12 = vcmp.lt.s32.totalorder %v2689_v37, 33 }
  0xce   : > { %1854 = vmatpush1.bf16.msk.msra.mxu0 %vm1853_vm4, %v1852_v54  ;;  %vm955_vm5 = vmand %vm4043_vm15, %vm4042_vm1  ;;  %1899 = vmatprep.subr.msk.bf16.mxu1 %vm1898_vm14, %v1897_v61  ;;  %v1855_v26 = vpack.c.bf16 %v691_v1, %v690_v4  ;;  %v1858_v14 = vpack.c.bf16 %v693_v2, %v692_v19  ;;  %v2210_v36 = vunpack.i.h.bf16 %v2208_v9  ;;  %v2209_v38 = vunpack.i.l.bf16 %v2208_v9 }
  0xcf   : > { %vm1901_vm2 = vmpackc.low %vm3259_vm11, %vm3259_vm11  ;;  %v956_v12 = vsel %vm955_vm5, 1, %v2395_v0  ;;  %vm3317_vm11 = vcmp.eq.s32.totalorder %v931_v62, 1  ;;  %v2205_v39 = vunpack.i.h.bf16 %v2203_v29  ;;  %v2204_v42 = vunpack.i.l.bf16 %v2203_v29  ;;  %v2218_v49 = vpop.permute.xlu1 %2217  ;;  %v2213_v51 = vpop.permute.xlu0 %2212 }
  0xd0   : > { %1902 = vmatpush1.bf16.msk.msra.mxu1 %vm1901_vm2, %v1900_v44  ;;  %vm3873_vm6 = vmpackc.low %vm3285_vm0, %vm3285_vm0  ;;  %vm3329_vm1 = vcmp.eq.s32.totalorder %v732_v13, 1  ;;  %v964_v50 = vrot.slane %v956_v12, %v2684_v35  ;;  %vm4052_vm15 = vcmp.ge.s32.totalorder %v2522_v10, 3  ;;  %vm4053_vm5 = vcmp.ge.s32.totalorder %v2509_v8, 2 }
  0xd1   : > { %vm3874_vm4 = vmpackc.low %vm2614_vm10, %vm2614_vm10  ;;  %1857 = vmatprep.subr.msk.bf16.mxu0 %vm3873_vm6, %v1855_v26  ;;  %v923_v40 = vsel %vm921_vm12, %v2205_v39, %v2210_v36  ;;  %v925_v54 = vsel %vm921_vm12, %v2210_v36, %v2205_v39  ;;  %v922_v56 = vsel %vm921_vm12, %v2204_v42, %v2209_v38  ;;  %v924_v57 = vsel %vm921_vm12, %v2209_v38, %v2204_v42 }
  0xd2   : > { %vm1904_vm14 = vmpackc.low %vm3295_vm3, %vm3295_vm3  ;;  %1860 = vmatpush1.bf16.msk.msra.mxu0 %vm3874_vm4, %v1858_v14  ;;  %v1903_v52 = vpack.c.bf16 %v923_v40, %v922_v56  ;;  %v1906_v48 = vpack.c.bf16 %v925_v54, %v924_v57  ;;  %vm3878_vm6 = vcmp.lt.s32.totalorder %v2689_v37, 16  ;;  %v960_v6 = vrot.slane %v956_v12, %v2536_v11 }
  0xd3   : > { %vm3343_vm2 = vmand %vm4053_vm5, %vm4052_vm15  ;;  %v2220_v15 = vunpack.i.h.bf16 %v2218_v49  ;;  %v2219_v59 = vunpack.i.l.bf16 %v2218_v49  ;;  %v2215_v58 = vunpack.i.h.bf16 %v2213_v51  ;;  %v2214_v21 = vunpack.i.l.bf16 %v2213_v51  ;;  %v2228_v32 = vpop.permute.xlu1 %2227  ;;  %v2223_v20 = vpop.permute.xlu0 %2222 }
  0xd4   : > { %vm1907_vm12 = vmpackc.low %vm3317_vm11, %vm3317_vm11  ;;  %1905 = vmatprep.subr.msk.bf16.mxu1 %vm1904_vm14, %v1903_v52  ;;  %vm950_vm15 = vcmp.lt.s32.totalorder %v2689_v37, 34  ;;  %vm3361_vm4 = vcmp.eq.s32.totalorder %v964_v50, 1  ;;  %v985_v61 = vsel %vm3343_vm2, 1, %v2395_v0  ;;  %vm4058_vm3 = vcmp.ge.s32.totalorder %v2522_v10, 2 }
  0xd5   : > { %vm3877_vm5 = vmpackc.low %vm3329_vm1, %vm3329_vm1  ;;  %v721_v44 = vsel %vm3878_vm6, %v2215_v58, %v2220_v15  ;;  %v723_v3 = vsel %vm3878_vm6, %v2220_v15, %v2215_v58  ;;  %v720_v5 = vsel %vm3878_vm6, %v2214_v21, %v2219_v59  ;;  %v722_v62 = vsel %vm3878_vm6, %v2219_v59, %v2214_v21  ;;  %1908 = vmatpush1.bf16.msk.msra.mxu1 %vm1907_vm12, %v1906_v48 }
  0xd6   : > { %vm4059_vm11 = vcmp.ge.s32.totalorder %v2509_v8, 1  ;;  %v1861_v7 = vpack.c.bf16 %v721_v44, %v720_v5  ;;  %v1864_v22 = vpack.c.bf16 %v723_v3, %v722_v62  ;;  %vm3876_vm2 = vmpackc.low %vm2650_vm13, %vm2650_vm13  ;;  %vm3383_vm8 = vcmp.eq.s32.totalorder %v960_v6, 1 }
  0xd7   : > { %vm781_vm14 = vmand %vm4059_vm11, %vm4058_vm3  ;;  %v761_v13 = vrot.slane %v2638_v27, %v2684_v35  ;;  %v2230_v12 = vunpack.i.h.bf16 %v2228_v32  ;;  %v2229_v1 = vunpack.i.l.bf16 %v2228_v32  ;;  %v2225_v2 = vunpack.i.h.bf16 %v2223_v20  ;;  %v2238_v38 = vpop.permute.xlu1 %2237  ;;  %v2233_v39 = vpop.permute.xlu0 %2232 }
  0xd8   : > { %v2224_v4 = vunpack.i.l.bf16 %v2223_v20  ;;  %1863 = vmatprep.subr.msk.bf16.mxu0 %vm3877_vm5, %v1861_v7  ;;  %vm3879_vm12 = vcmp.lt.s32.totalorder %v2689_v37, 17  ;;  %v993_v19 = vrot.slane %v985_v61, %v2684_v35  ;;  %v782_v26 = vsel %vm781_vm14, 1, %v2395_v0  ;;  %vm1910_vm3 = vmpackc.low %vm3361_vm4, %vm3361_vm4 }
  0xd9   : > { %v952_v14 = vsel %vm950_vm15, %v2225_v2, %v2230_v12  ;;  %v954_v27 = vsel %vm950_vm15, %v2230_v12, %v2225_v2  ;;  %1866 = vmatpush1.bf16.msk.msra.mxu0 %vm3876_vm2, %v1864_v22  ;;  %vm1913_vm11 = vmpackc.low %vm3383_vm8, %vm3383_vm8  ;;  %vm3416_vm14 = vcmp.eq.s32.totalorder %v761_v13, 1  ;;  %v989_v50 = vrot.slane %v985_v61, %v2536_v11 }
  0xda   : > { %v951_v9 = vsel %vm950_vm15, %v2224_v4, %v2229_v1  ;;  %v953_v29 = vsel %vm950_vm15, %v2229_v1, %v2224_v4  ;;  %v2240_v40 = vunpack.i.h.bf16 %v2238_v38  ;;  %v2239_v54 = vunpack.i.l.bf16 %v2238_v38 }
  0xdb   : > { %v1909_v34 = vpack.c.bf16 %v952_v14, %v951_v9  ;;  %v1912_v36 = vpack.c.bf16 %v954_v27, %v953_v29  ;;  %v2235_v56 = vunpack.i.h.bf16 %v2233_v39  ;;  %v2234_v57 = vunpack.i.l.bf16 %v2233_v39  ;;  %v2248_v58 = vpop.permute.xlu1 %2247  ;;  %v2243_v21 = vpop.permute.xlu0 %2242 }
  0xdc   : > { %vm4064_vm4 = vcmp.ge.s32.totalorder %v2522_v10, 4  ;;  %vm4065_vm15 = vcmp.ge.s32.totalorder %v2509_v8, 2  ;;  %vm3430_vm6 = vcmp.eq.s32.totalorder %v993_v19, 1  ;;  %v790_v48 = vrot.slane %v782_v26, %v2684_v35 }
  0xdd   : > { %vm3425_vm2 = vmand %vm4065_vm15, %vm4064_vm4  ;;  %1911 = vmatprep.subr.msk.bf16.mxu1 %vm1910_vm3, %v1909_v34  ;;  %v786_v49 = vrot.slane %v782_v26, %v2536_v11  ;;  %v749_v10 = vsel %vm3879_vm12, %v2235_v56, %v2240_v40  ;;  %v751_v8 = vsel %vm3879_vm12, %v2240_v40, %v2235_v56  ;;  %v748_v51 = vsel %vm3879_vm12, %v2234_v57, %v2239_v54 }
  0xde   : > { %v750_v6 = vsel %vm3879_vm12, %v2239_v54, %v2234_v57  ;;  %1914 = vmatpush1.bf16.msk.msra.mxu1 %vm1913_vm11, %v1912_v36  ;;  %vm3882_vm3 = vmpackc.low %vm3416_vm14, %vm3416_vm14  ;;  %v1867_v15 = vpack.c.bf16 %v749_v10, %v748_v51  ;;  %vm4070_vm4 = vnez %v3901_v31  ;;  %vm3455_vm5 = vcmp.eq.s32.totalorder %v989_v50, 1  ;;  %v1029_v51 = vld [vmem:[%s3836_s3] sm:$0xff] }
  0xdf   : > { %v1870_v59 = vpack.c.bf16 %v751_v8, %v750_v6  ;;  %v1014_v61 = vsel %vm3425_vm2, 1, %v2395_v0  ;;  %v2250_v44 = vunpack.i.h.bf16 %v2248_v58  ;;  %v2249_v3 = vunpack.i.l.bf16 %v2248_v58  ;;  %vm4081_vm8 = vmpackc.low %vm4070_vm4, %vm4070_vm4  ;;  %v2258_v1 = vpop.permute.xlu1 %2257  ;;  %v2253_v2 = vpop.permute.xlu0 %2252 }
  0xe0   : > { %v2245_v5 = vunpack.i.h.bf16 %v2243_v21  ;;  %v2244_v62 = vunpack.i.l.bf16 %v2243_v21  ;;  %1869 = vmatprep.subr.msk.bf16.mxu0 %vm3882_vm3, %v1867_v15  ;;  %vm3468_vm11 = vcmp.eq.s32.totalorder %v790_v48, 1  ;;  %vm3472_vm12 = vcmp.eq.s32.totalorder %v786_v49, 1  ;;  %vm1916_vm7 = vmpackc.low %vm3430_vm6, %vm3430_vm6 }
  0xe1   : > { %vm4077_vm2 = vcmp.lt.s32.totalorder %v2689_v37, 35  ;;  %1872 = vmatpush1.bf16.msk.msra.mxu0 %vm4081_vm8, %v1870_v59  ;;  %v1022_v4 = vrot.slane %v1014_v61, %v2684_v35  ;;  %v1018_v19 = vrot.slane %v1014_v61, %v2536_v11  ;;  %v2260_v26 = vunpack.i.h.bf16 %v2258_v1  ;;  %v1031_v59 = vld [vmem:[%s3836_s3 + $0x10] sm:$0xff] }
  0xe2   : > { %v981_v0 = vsel %vm4077_vm2, %v2245_v5, %v2250_v44  ;;  %vm4078_vm15 = vmmov %vm4077_vm2  ;;  %v2259_v14 = vunpack.i.l.bf16 %v2258_v1  ;;  %v2255_v27 = vunpack.i.h.bf16 %v2253_v2  ;;  %v2254_v9 = vunpack.i.l.bf16 %v2253_v2 }
  0xe3   : > { %v983_v32 = vsel %vm4078_vm15, %v2250_v44, %v2245_v5  ;;  %vm4079_vm9 = vmmov %vm4077_vm2  ;;  %vm4082_vm6 = vcmp.lt.s32.totalorder %v2689_v37, 18  ;;  %v2268_v39 = vpop.permute.xlu1 %2267  ;;  %v2263_v50 = vpop.permute.xlu0 %2262 }
  0xe4   : > { %v980_v20 = vsel %vm4079_vm9, %v2244_v62, %v2249_v3  ;;  %vm4080_vm3 = vmmov %vm4077_vm2  ;;  %v778_v29 = vsel %vm4082_vm6, %v2255_v27, %v2260_v26  ;;  %v2270_v56 = vunpack.i.h.bf16 %v2268_v39  ;;  %v2269_v57 = vunpack.i.l.bf16 %v2268_v39 }
  0xe5   : > { %v982_v63 = vsel %vm4080_vm3, %v2249_v3, %v2244_v62  ;;  %v1915_v13 = vpack.c.bf16 %v981_v0, %v980_v20  ;;  %vm1919_vm9 = vmpackc.low %vm3455_vm5, %vm3455_vm5  ;;  %vm1008_vm3 = vcmp.lt.s32.totalorder %v2689_v37, 36  ;;  %v2265_v43 = vunpack.i.h.bf16 %v2263_v50  ;;  %v3547_v0 = vld [vmem:[%s347_s28] sm:$0xff] }
  0xe6   : > { %v1918_v12 = vpack.c.bf16 %v983_v32, %v982_v63  ;;  %vm4083_vm15 = vmmov %vm4082_vm6  ;;  %v2264_v52 = vunpack.i.l.bf16 %v2263_v50 }
  0xe7   : > { %1917 = vmatprep.subr.msk.bf16.mxu1 %vm1916_vm7, %v1915_v13  ;;  %v780_v34 = vsel %vm4083_vm15, %v2260_v26, %v2255_v27  ;;  %vm4084_vm8 = vmmov %vm4082_vm6  ;;  %vm3516_vm15 = vcmp.eq.s32.totalorder %v1018_v19, 1  ;;  %v1010_v48 = vsel %vm1008_vm3, %v2265_v43, %v2270_v56  ;;  %v1012_v49 = vsel %vm1008_vm3, %v2270_v56, %v2265_v43  ;;  %v3555_v13 = vld [vmem:[%s347_s28 + $0x8] sm:$0xff] }
  0xe8   : > { %v777_v36 = vsel %vm4084_vm8, %v2254_v9, %v2259_v14  ;;  %vm4085_vm5 = vmmov %vm4082_vm6  ;;  %1920 = vmatpush1.bf16.msk.msra.mxu1 %vm1919_vm9, %v1918_v12  ;;  %vm3512_vm6 = vcmp.eq.s32.totalorder %v1022_v4, 1  ;;  %v1009_v10 = vsel %vm1008_vm3, %v2264_v52, %v2269_v57  ;;  %v1011_v8 = vsel %vm1008_vm3, %v2269_v57, %v2264_v52  ;;  %v1318_v4 = vld [vmem:[%s3839_s6] sm:$0xff]  ;;  %v1317_v19 = vld [vmem:[%s3838_s5 + $0x8] sm:$0xff] }
  0xe9   : > { %v779_v35 = vsel %vm4085_vm5, %v2259_v14, %v2254_v9  ;;  %vm1874_vm2 = vmpackc.low %vm3468_vm11, %vm3468_vm11  ;;  %v1873_v11 = vpack.c.bf16 %v778_v29, %v777_v36  ;;  %v1921_v6 = vpack.c.bf16 %v1010_v48, %v1009_v10  ;;  %v1924_v15 = vpack.c.bf16 %v1012_v49, %v1011_v8 }
  0xea   : > { %v1876_v38 = vpack.c.bf16 %v780_v34, %v779_v35  ;;  %vm1877_vm7 = vmpackc.low %vm3472_vm12, %vm3472_vm12  ;;  %vm1324_vm8 = vcmask 130048   ;;  %vm4090_vm5 = vcmp.lt.s32.totalorder %v2689_v37, 17 }
  0xeb   : > { %1875 = vmatprep.subr.msk.bf16.mxu0 %vm1874_vm2, %v1873_v11  ;;  %vm1922_vm12 = vmpackc.low %vm3512_vm6, %vm3512_vm6 }
  0xec   : > { %1878 = vmatpush1.bf16.msk.msra.mxu0 %vm1877_vm7, %v1876_v38  ;;  %vm1925_vm11 = vmpackc.low %vm3516_vm15, %vm3516_vm15  ;;  %1923 = vmatprep.subr.msk.bf16.mxu1 %vm1922_vm12, %v1921_v6  ;;  %vm4095_vm12 = vcmp.lt.s32.totalorder %v2689_v37, 16 }
  0xed   : > { %1926 = vmatpush1.bf16.msk.msra.mxu1 %vm1925_vm11, %v1924_v15  ;;  %vm4091_vm2 = vmmov %vm4090_vm5 }
  0xee   : > { %v1036_v58 = vpop.permute.xlu0 %1035  ;;  %vm4092_vm7 = vmmov %vm4091_vm2 }
  0xef   : > { %1103 = vmatmul.mubr.f32.vlgmr.msra.gmra.mrb[0].mxu0 %v1029_v51  ;;  %vm4093_vm6 = vmmov %vm4091_vm2 }
  0xf0   : > { %1544 = vmatprep.mubr.f32.mxu0 %v2417_v33  ;;  %1174 = vmatmul.mubr.f32.vlgmr.msra.gmra.mrb[0].mxu1 %v1031_v59  ;;  %vm4094_vm15 = vmpackc.low %vm3416_vm14, %vm3416_vm14 }
  0xf1   : > { %1762 = vmatprep.mubr.msk.f32.mxu1 %vm1324_vm8, %v1317_v19  ;;  %vm4096_vm11 = vmmov %vm4095_vm12 }
  0xf2   : > { %vm4099_vm8 = vmpackc.low %vm4070_vm4, %vm4070_vm4 }
 0x1c2   : > { %v1104_v21 = vpop.f32.mrb[0].mxu0 }
 0x1c3   : > { %v1105_v60 = vadd.f32 %v1104_v21, %v1036_v58  ;;  %v1106_v61 = vpop.f32.mrb[1].mxu0  ;;  %v1175_v3 = vpop.f32.mrb[0].mxu1 }
 0x1c4   : > { %v1107_v44 = vadd.f32 %v1106_v61, %v1036_v58  ;;  %v1177_v62 = vpop.f32.mrb[1].mxu1 }
 0x1c5   : > { %v1176_v5 = vadd.f32 %v1175_v3, %v1105_v60 }
 0x1c6   : > { %v1178_v7 = vadd.f32 %v1177_v62, %v1107_v44 }
 0x1c7   : > { %vm1180_vm9 = vcmp.ge.f32.partialorder %v1176_v5, 0.0  ;;  %v1182_v22 = vmul.f32 0.2, %v1176_v5 }
 0x1c8   : > { %vm1181_vm3 = vcmp.ge.f32.partialorder %v1178_v7, 0.0  ;;  %v1183_v33 = vmul.f32 0.2, %v1178_v7 }
 0x1c9   : > { %v3549_v32 = vsel %vm1180_vm9, %v1176_v5, %v1182_v22  ;;  %vm4097_vm9 = vmmov %vm4096_vm11 }
 0x1ca   : > { %v2277_v20 = vpack.i.bf16 %v3549_v32, %v3547_v0  ;;  %v3553_v63 = vsel %vm1181_vm3, %v1178_v7, %v1183_v33  ;;  %v1953_v2 = vpack.c.bf16 %v3549_v32, %v3547_v0  ;;  %vm4098_vm3 = vmmov %vm4097_vm9 }
 0x1cb   : > { %v2292_v12 = vpack.i.bf16 %v3553_v63, %v3555_v13  ;;  %v1951_v1 = vpack.c.bf16 %v3553_v63, %v3555_v13 }
 0x1cc   : > { %2278 = vrot.lane.b32.xlu0 %v2277_v20, %s2413_s19  ;;  %2273 = vrot.lane.b32.xlu1 %v2277_v20, %s2415_s22 }
 0x1d0   : > { %2283 = vrot.lane.b32.xlu0 %v2277_v20, %s2411_s17  ;;  %2293 = vrot.lane.b32.xlu1 %v2292_v12, %s2415_s22 }
 0x1d4   : > { %2288 = vrot.lane.b32.xlu0 %v2277_v20, %s2403_s26  ;;  %2298 = vrot.lane.b32.xlu1 %v2292_v12, %s2413_s19 }
 0x1d8   : > { %2313 = vrot.lane.b32.xlu0 %v2277_v20, %s2402_s25  ;;  %2303 = vrot.lane.b32.xlu1 %v2292_v12, %s2411_s17 }
 0x1dc   : > { %2318 = vrot.lane.b32.xlu0 %v2277_v20, %s2398_s21  ;;  %2308 = vrot.lane.b32.xlu1 %v2292_v12, %s2403_s26 }
 0x1e0   : > { %2323 = vrot.lane.b32.xlu0 %v2277_v20, %s2396_s15  ;;  %2333 = vrot.lane.b32.xlu1 %v2292_v12, %s2402_s25 }
 0x1e4   : > { %2328 = vrot.lane.b32.xlu0 %v2277_v20, %s2397_s16  ;;  %2338 = vrot.lane.b32.xlu1 %v2292_v12, %s2398_s21 }
 0x1e8   : > { %1321 = vperm.xlu0 %2271, %v1318_v4   ;;  %2343 = vrot.lane.b32.xlu1 %v2292_v12, %s2396_s15 }
 0x1ec   : > { %2348 = vrot.lane.b32.xlu1 %v2292_v12, %s2397_s16 }
 0x23e   : > { %v2279_v26 = vpop.permute.xlu0 %2278  ;;  %v2274_v14 = vpop.permute.xlu1 %2273 }
 0x23f   : > { %v2276_v29 = vunpack.i.h.bf16 %v2274_v14  ;;  %v2275_v34 = vunpack.i.l.bf16 %v2274_v14  ;;  %v2281_v43 = vunpack.i.h.bf16 %v2279_v26  ;;  %v2280_v52 = vunpack.i.l.bf16 %v2279_v26 }
 0x242   : > { %v2284_v27 = vpop.permute.xlu0 %2283  ;;  %v2294_v9 = vpop.permute.xlu1 %2293 }
 0x243   : > { %v2296_v36 = vunpack.i.h.bf16 %v2294_v9  ;;  %v2295_v35 = vunpack.i.l.bf16 %v2294_v9  ;;  %v2286_v60 = vunpack.i.h.bf16 %v2284_v27  ;;  %v2285_v61 = vunpack.i.l.bf16 %v2284_v27 }
 0x245   : > { %v1196_v11 = vsel %vm4090_vm5, %v2275_v34, %v2295_v35  ;;  %v1197_v38 = vsel %vm4091_vm2, %v2276_v29, %v2296_v36  ;;  %v1198_v39 = vsel %vm4092_vm7, %v2295_v35, %v2275_v34  ;;  %v1199_v50 = vsel %vm4093_vm6, %v2296_v36, %v2276_v29  ;;  %vm4100_vm5 = vmpackc.low %vm3329_vm1, %vm3329_vm1 }
 0x246   : > { %v1927_v40 = vpack.c.bf16 %v1197_v38, %v1196_v11  ;;  %v1930_v54 = vpack.c.bf16 %v1199_v50, %v1198_v39  ;;  %v2289_v56 = vpop.permute.xlu0 %2288  ;;  %v2299_v57 = vpop.permute.xlu1 %2298  ;;  %vm4101_vm2 = vcmp.lt.s32.totalorder %v2689_v37, 15 }
 0x247   : > { %v2301_v48 = vunpack.i.h.bf16 %v2299_v57  ;;  %v2300_v49 = vunpack.i.l.bf16 %v2299_v57  ;;  %vm4102_vm7 = vmmov %vm4101_vm2  ;;  %v2291_v4 = vunpack.i.h.bf16 %v2289_v56  ;;  %v2290_v19 = vunpack.i.l.bf16 %v2289_v56 }
 0x248   : > { %1929 = vmatprep.subr.msk.bf16.mxu1 %vm4094_vm15, %v1927_v40  ;;  %vm4103_vm6 = vmmov %vm4101_vm2 }
 0x249   : > { %v1213_v10 = vsel %vm4095_vm12, %v2281_v43, %v2301_v48  ;;  %v1215_v8 = vsel %vm4096_vm11, %v2301_v48, %v2281_v43  ;;  %v1212_v51 = vsel %vm4097_vm9, %v2280_v52, %v2300_v49  ;;  %v1214_v6 = vsel %vm4098_vm3, %v2300_v49, %v2280_v52  ;;  %1932 = vmatpush1.bf16.msk.msra.mxu1 %vm4099_vm8, %v1930_v54  ;;  %vm4104_vm15 = vmmov %vm4101_vm2 }
 0x24a   : > { %v1933_v15 = vpack.c.bf16 %v1213_v10, %v1212_v51  ;;  %v1936_v59 = vpack.c.bf16 %v1215_v8, %v1214_v6  ;;  %v2314_v58 = vpop.permute.xlu0 %2313  ;;  %v2304_v21 = vpop.permute.xlu1 %2303  ;;  %vm4105_vm12 = vmpackc.low %vm2650_vm13, %vm2650_vm13  ;;  %vm4107_vm9 = vcmp.lt.s32.totalorder %v2689_v37, 1 }
 0x24b   : > { %v2306_v44 = vunpack.i.h.bf16 %v2304_v21  ;;  %v2305_v3 = vunpack.i.l.bf16 %v2304_v21  ;;  %vm4106_vm11 = vmpackc.low %vm3285_vm0, %vm3285_vm0  ;;  %v2316_v39 = vunpack.i.h.bf16 %v2314_v58  ;;  %v2315_v50 = vunpack.i.l.bf16 %v2314_v58 }
 0x24c   : > { %1935 = vmatprep.subr.msk.bf16.mxu1 %vm4100_vm5, %v1933_v15  ;;  %vm4108_vm3 = vmmov %vm4107_vm9 }
 0x24d   : > { %v1229_v5 = vsel %vm4101_vm2, %v2286_v60, %v2306_v44  ;;  %v1231_v62 = vsel %vm4102_vm7, %v2306_v44, %v2286_v60  ;;  %v1228_v7 = vsel %vm4103_vm6, %v2285_v61, %v2305_v3  ;;  %v1230_v22 = vsel %vm4104_vm15, %v2305_v3, %v2285_v61  ;;  %1938 = vmatpush1.bf16.msk.msra.mxu1 %vm4105_vm12, %v1936_v59  ;;  %vm4109_vm8 = vmmov %vm4108_vm3 }
 0x24e   : > { %v1939_v33 = vpack.c.bf16 %v1229_v5, %v1228_v7  ;;  %v1942_v20 = vpack.c.bf16 %v1231_v62, %v1230_v22  ;;  %v2309_v12 = vpop.permute.xlu1 %2308  ;;  %v2319_v26 = vpop.permute.xlu0 %2318  ;;  %vm4110_vm5 = vmmov %vm4108_vm3  ;;  %vm4112_vm7 = vnez %v3972_v28  ;;  %vm4114_vm15 = vcmp.lt.s32.totalorder %v2689_v37, 127 }
 0x24f   : > { %v2311_v14 = vunpack.i.h.bf16 %v2309_v12  ;;  %v2310_v27 = vunpack.i.l.bf16 %v2309_v12  ;;  %vm4111_vm2 = vmpackc.low %vm2614_vm10, %vm2614_vm10  ;;  %v2321_v48 = vunpack.i.h.bf16 %v2319_v26  ;;  %v2320_v49 = vunpack.i.l.bf16 %v2319_v26 }
 0x250   : > { %1941 = vmatprep.subr.msk.bf16.mxu1 %vm4106_vm11, %v1939_v33  ;;  %vm4113_vm6 = vmpackc.low %vm4112_vm7, %vm4112_vm7  ;;  %vm4116_vm11 = vnez %v3895_v24 }
 0x251   : > { %v1245_v9 = vsel %vm4107_vm9, %v2291_v4, %v2311_v14  ;;  %v1247_v29 = vsel %vm4108_vm3, %v2311_v14, %v2291_v4  ;;  %v1244_v34 = vsel %vm4109_vm8, %v2290_v19, %v2310_v27  ;;  %v1246_v36 = vsel %vm4110_vm5, %v2310_v27, %v2290_v19  ;;  %1944 = vmatpush1.bf16.msk.msra.mxu1 %vm4111_vm2, %v1942_v20  ;;  %vm4115_vm12 = vmmov %vm4114_vm15 }
 0x252   : > { %v1945_v35 = vpack.c.bf16 %v1245_v9, %v1244_v34  ;;  %v1948_v11 = vpack.c.bf16 %v1247_v29, %v1246_v36  ;;  %v2334_v38 = vpop.permute.xlu1 %2333  ;;  %v2324_v56 = vpop.permute.xlu0 %2323  ;;  %vm4117_vm9 = vmpackc.low %vm4116_vm11, %vm4116_vm11  ;;  %vm4120_vm5 = vcmp.lt.s32.totalorder %v2689_v37, 113 }
 0x253   : > { %v2336_v40 = vunpack.i.h.bf16 %v2334_v38  ;;  %v2335_v54 = vunpack.i.l.bf16 %v2334_v38  ;;  %vm4118_vm3 = vmmov %vm4115_vm12  ;;  %v2326_v63 = vunpack.i.h.bf16 %v2324_v56 }
 0x254   : > { %1947 = vmatprep.subr.msk.bf16.mxu1 %vm4113_vm6, %v1945_v35  ;;  %vm4119_vm8 = vmmov %vm4118_vm3  ;;  %vm4122_vm6 = vnez %v3944_v47 }
 0x255   : > { %v1263_v57 = vsel %vm4114_vm15, %v2336_v40, %v2316_v39  ;;  %v1262_v43 = vsel %vm4115_vm12, %v2335_v54, %v2315_v50  ;;  %1950 = vmatpush1.bf16.msk.msra.mxu1 %vm4117_vm9, %v1948_v11  ;;  %v1261_v51 = vsel %vm4118_vm3, %v2316_v39, %v2336_v40  ;;  %v1260_v6 = vsel %vm4119_vm8, %v2315_v50, %v2335_v54  ;;  %vm4121_vm2 = vmmov %vm4120_vm5  ;;  %v1316_v11 = vld [vmem:[%s3838_s5] sm:$0xff] }
 0x256   : > { %v2339_v52 = vpop.permute.xlu1 %2338  ;;  %1952 = vmatprep.subr.bf16.mxu1 %v1951_v1  ;;  %v1955_v15 = vpack.c.bf16 %v1263_v57, %v1262_v43  ;;  %vm4123_vm15 = vmpackc.low %vm4122_vm6, %vm4122_vm6  ;;  %v2325_v1 = vunpack.i.l.bf16 %v2324_v56  ;;  %v1958_v21 = vpack.c.bf16 %v1261_v51, %v1260_v6  ;;  %v2329_v60 = vpop.permute.xlu0 %2328  ;;  %vm4126_vm3 = vcmp.lt.s32.totalorder %v2689_v37, 112 }
 0x257   : > { %v2341_v10 = vunpack.i.h.bf16 %v2339_v52  ;;  %v2340_v8 = vunpack.i.l.bf16 %v2339_v52  ;;  %vm4124_vm12 = vmmov %vm4121_vm2  ;;  %v2331_v62 = vunpack.i.h.bf16 %v2329_v60  ;;  %v2330_v22 = vunpack.i.l.bf16 %v2329_v60 }
 0x258   : > { %vm4125_vm9 = vmmov %vm4121_vm2 }
 0x259   : > { %v1279_v59 = vsel %vm4120_vm5, %v2341_v10, %v2321_v48  ;;  %v1278_v58 = vsel %vm4121_vm2, %v2340_v8, %v2320_v49  ;;  %1954 = vmatpush1.bf16.msra.mxu1 %v1953_v2  ;;  %v1277_v3 = vsel %vm4124_vm12, %v2321_v48, %v2341_v10  ;;  %v1276_v0 = vsel %vm4125_vm9, %v2320_v49, %v2340_v8  ;;  %vm4127_vm8 = vmmov %vm4126_vm3  ;;  %v1470_v49 = vld [vmem:[%s3841_s8] sm:$0xff] }
 0x25a   : > { %v2344_v13 = vpop.permute.xlu1 %2343  ;;  %1957 = vmatprep.subr.msk.bf16.mxu1 %vm4123_vm15, %v1955_v15  ;;  %v1961_v32 = vpack.c.bf16 %v1279_v59, %v1278_v58  ;;  %vm4128_vm5 = vnez %v3949_v53  ;;  %vm4130_vm15 = vnez %v3911_v23  ;;  %v1964_v33 = vpack.c.bf16 %v1277_v3, %v1276_v0  ;;  %vm4132_vm9 = vmmov %vm4126_vm3 }
 0x25b   : > { %v2346_v61 = vunpack.i.h.bf16 %v2344_v13  ;;  %v2345_v44 = vunpack.i.l.bf16 %v2344_v13  ;;  %vm4129_vm2 = vmpackc.low %vm4128_vm5, %vm4128_vm5  ;;  %vm4137_vm5 = vnez %v3907_v55 }
 0x25c   : > { %vm4131_vm12 = vmpackc.low %vm4130_vm15, %vm4130_vm15  ;;  %vm4135_vm15 = vnez %v3893_v17 }
 0x25d   : > { %v1295_v2 = vsel %vm4126_vm3, %v2346_v61, %v2326_v63  ;;  %v1294_v5 = vsel %vm4127_vm8, %v2345_v44, %v2325_v1  ;;  %1960 = vmatpush1.bf16.msk.msra.mxu1 %vm4129_vm2, %v1958_v21  ;;  %v1293_v4 = vsel %vm4132_vm9, %v2326_v63, %v2346_v61  ;;  %v1292_v19 = vsel %vm4126_vm3, %v2325_v1, %v2345_v44  ;;  %vm4138_vm9 = vmpackc.low %vm4137_vm5, %vm4137_vm5 }
 0x25e   : > { %v2349_v7 = vpop.permute.xlu1 %2348  ;;  %1963 = vmatprep.subr.msk.bf16.mxu1 %vm4131_vm12, %v1961_v32  ;;  %v1967_v26 = vpack.c.bf16 %v1295_v2, %v1294_v5  ;;  %vm4133_vm8 = vcmp.lt.s32.totalorder %v2689_v37, 111  ;;  %vm4136_vm12 = vmpackc.low %vm4135_vm15, %vm4135_vm15  ;;  %v1970_v9 = vpack.c.bf16 %v1293_v4, %v1292_v19 }
 0x25f   : > { %v2351_v20 = vunpack.i.h.bf16 %v2349_v7  ;;  %v2350_v12 = vunpack.i.l.bf16 %v2349_v7  ;;  %vm4134_vm2 = vmmov %vm4133_vm8 }
 0x260   : > { %vm4139_vm3 = vmmov %vm4134_vm2 }
 0x261   : > { %v1311_v14 = vsel %vm4133_vm8, %v2351_v20, %v2331_v62  ;;  %v1310_v27 = vsel %vm4134_vm2, %v2350_v12, %v2330_v22  ;;  %1966 = vmatpush1.bf16.msk.msra.mxu1 %vm4136_vm12, %v1964_v33  ;;  %v1309_v29 = vsel %vm4139_vm3, %v2331_v62, %v2351_v20  ;;  %vm4140_vm8 = vmmov %vm4134_vm2  ;;  %vm4141_vm2 = vnez %v3891_v16 }
 0x262   : > { %1969 = vmatprep.subr.msk.bf16.mxu1 %vm4138_vm9, %v1967_v26  ;;  %v1308_v34 = vsel %vm4140_vm8, %v2330_v22, %v2350_v12  ;;  %v1973_v36 = vpack.c.bf16 %v1311_v14, %v1310_v27  ;;  %vm4142_vm15 = vmpackc.low %vm4141_vm2, %vm4141_vm2  ;;  %vm4143_vm12 = vnez %v3903_v45  ;;  %vm4145_vm9 = vnez %v3905_v46 }
 0x263   : > { %vm4144_vm5 = vmpackc.low %vm4143_vm12, %vm4143_vm12  ;;  %v1976_v35 = vpack.c.bf16 %v1309_v29, %v1308_v34  ;;  %vm4147_vm8 = vcmp.lt.s32.totalorder %v2689_v37, 16 }
 0x264   : > { %vm4146_vm3 = vmpackc.low %vm4145_vm9, %vm4145_vm9 }
 0x265   : > { %1972 = vmatpush1.bf16.msk.msra.mxu1 %vm4142_vm15, %v1970_v9  ;;  %vm1980_vm9 = vmpackc.low %vm3329_vm1, %vm3416_vm14 }
 0x266   : > { %1975 = vmatprep.subr.msk.bf16.mxu1 %vm4144_vm5, %v1973_v36  ;;  %vm4155_vm14 = vmpackc.low %vm2650_vm13, %vm4070_vm4  ;;  %vm2420_vm4 = vmmov 1  }
 0x267   : > { %v1322_v38 = vpop.permute.xlu0 %1321 }
 0x269   : > { %1978 = vmatpush1.bf16.msk.msra.mxu1 %vm4146_vm3, %v1976_v35  ;;  %vm4148_vm3 = vmmov %vm4147_vm8 }
 0x26c   : > { %1393 = vmatmul.mubr.f32.vlgmr.msra.gmra.mrb[2].mxu1 %v1316_v11 }
 0x33f   : > { %v1394_v39 = vpop.f32.mrb[2].mxu1 }
 0x340   : > { %v1395_v50 = vadd.f32 %v1394_v39, %v1322_v38  ;;  %v1396_v40 = vpop.f32.mrb[3].mxu1 }
 0x341   : > { %v1397_v54 = vadd.f32 %v1396_v40, %v1322_v38 }
 0x342   : > { %vm1399_vm15 = vcmp.ge.f32.partialorder %v1395_v50, 0.0  ;;  %v1401_v56 = vmul.f32 0.2, %v1395_v50 }
 0x343   : > { %vm1400_vm5 = vcmp.ge.f32.partialorder %v1397_v54, 0.0  ;;  %v1402_v57 = vmul.f32 0.2, %v1397_v54 }
 0x344   : > { %v3738_v43 = vsel %vm1399_vm15, %v1395_v50, %v1401_v56  ;;  %vm4149_vm15 = vcmp.lt.s32.totalorder %v2689_v37, 17 }
 0x345   : > { %v1404_v52 = vsel %vm1400_vm5, %v1397_v54, %v1402_v57  ;;  %vm4150_vm5 = vmmov %vm4149_vm15 }
 0x346   : > { %v2357_v48 = vpack.i.bf16 %v1404_v52, %v3738_v43 }
 0x348   : > { %2358 = vrot.lane.b32.xlu0 %v2357_v48, %s2413_s19  ;;  %2353 = vrot.lane.b32.xlu1 %v2357_v48, %s2415_s22 }
 0x34c   : > { %2368 = vrot.lane.b32.xlu0 %v2357_v48, %s2403_s26  ;;  %2363 = vrot.lane.b32.xlu1 %v2357_v48, %s2411_s17  ;;  %s352_s26 = scalar_lea.vmem %s3842_s9, %s1783_s23 }
 0x350   : > { %2378 = vrot.lane.b32.xlu0 %v2357_v48, %s2398_s21  ;;  %2373 = vrot.lane.b32.xlu1 %v2357_v48, %s2402_s25 }
 0x354   : > { %1461 = vrot.lane.b32.xlu0 %v3738_v43, %s2397_s16  ;;  %2383 = vrot.lane.b32.xlu1 %v2357_v48, %s2396_s15 }
 0x358   : > { %1473 = vperm.xlu0 %2271, %v1470_v49   ;;  %1463 = vrot.lane.b32.xlu1 %v1404_v52, %s2397_s16 }
 0x3ba   : > { %v2359_v10 = vpop.permute.xlu0 %2358  ;;  %v2354_v8 = vpop.permute.xlu1 %2353 }
 0x3bb   : > { %v2361_v51 = vunpack.i.h.bf16 %v2359_v10  ;;  %v2360_v6 = vunpack.i.l.bf16 %v2359_v10  ;;  %v2356_v15 = vunpack.i.h.bf16 %v2354_v8  ;;  %v2355_v59 = vunpack.i.l.bf16 %v2354_v8 }
 0x3bd   : > { %v1417_v58 = vsel %vm4147_vm8, %v2360_v6, %v2361_v51  ;;  %v1418_v63 = vsel %vm4148_vm3, %v2361_v51, %v2360_v6  ;;  %v1409_v13 = vsel %vm4149_vm15, %v2355_v59, %v2356_v15  ;;  %v1410_v1 = vsel %vm4150_vm5, %v2356_v15, %v2355_v59 }
 0x3be   : > { %v1979_v21 = vpack.c.bf16 %v1417_v58, %v1409_v13  ;;  %v1982_v60 = vpack.c.bf16 %v1418_v63, %v1410_v1  ;;  %v2369_v61 = vpop.permute.xlu0 %2368  ;;  %v2364_v44 = vpop.permute.xlu1 %2363  ;;  %vm4151_vm8 = vcmp.lt.s32.totalorder %v2689_v37, 1  ;;  %vm4153_vm15 = vcmp.lt.s32.totalorder %v2689_v37, 15 }
 0x3bf   : > { %v2371_v3 = vunpack.i.h.bf16 %v2369_v61  ;;  %v2370_v0 = vunpack.i.l.bf16 %v2369_v61  ;;  %v2366_v32 = vunpack.i.h.bf16 %v2364_v44  ;;  %v2365_v2 = vunpack.i.l.bf16 %v2364_v44  ;;  %vm4152_vm3 = vmmov %vm4151_vm8 }
 0x3c0   : > { %1981 = vmatprep.subr.msk.bf16.mxu0 %vm1980_vm9, %v1979_v21  ;;  %vm4154_vm1 = vmmov %vm4153_vm15  ;;  %vm4156_vm5 = vcmp.lt.s32.totalorder %v2689_v37, 127 }
 0x3c1   : > { %v1433_v5 = vsel %vm4151_vm8, %v2370_v0, %v2371_v3  ;;  %v1434_v62 = vsel %vm4152_vm3, %v2371_v3, %v2370_v0  ;;  %v1425_v42 = vsel %vm4153_vm15, %v2365_v2, %v2366_v32  ;;  %v1426_v41 = vsel %vm4154_vm1, %v2366_v32, %v2365_v2  ;;  %1984 = vmatpush1.bf16.msk.msra.mxu0 %vm4155_vm14, %v1982_v60  ;;  %vm1986_vm9 = vmpackc.low %vm4112_vm7, %vm3285_vm0 }
 0x3c2   : > { %v1985_v7 = vpack.c.bf16 %v1433_v5, %v1425_v42  ;;  %v1988_v22 = vpack.c.bf16 %v1434_v62, %v1426_v41  ;;  %v2379_v33 = vpop.permute.xlu0 %2378  ;;  %v2374_v20 = vpop.permute.xlu1 %2373  ;;  %vm4157_vm13 = vmmov %vm4156_vm5  ;;  %vm4159_vm8 = vnez %v3949_v53  ;;  %vm4160_vm15 = vcmp.lt.s32.totalorder %v2689_v37, 113 }
 0x3c3   : > { %v2376_v12 = vunpack.i.h.bf16 %v2374_v20  ;;  %v2375_v4 = vunpack.i.l.bf16 %v2374_v20  ;;  %v2381_v19 = vunpack.i.h.bf16 %v2379_v33  ;;  %v2380_v26 = vunpack.i.l.bf16 %v2379_v33  ;;  %vm4158_vm0 = vmpackc.low %vm4116_vm11, %vm2614_vm10 }
 0x3c4   : > { %1987 = vmatprep.subr.msk.bf16.mxu0 %vm1986_vm9, %v1985_v7  ;;  %vm1992_vm7 = vmpackc.low %vm4122_vm6, %vm2420_vm4  ;;  %vm4162_vm11 = vcmp.lt.s32.totalorder %v2689_v37, 112  ;;  %vm4164_vm1 = vnez %v3911_v23  ;;  %vm4165_vm14 = vnez %v3907_v55  ;;  %v1469_v55 = vld [vmem:[%s3840_s7] sm:$0xff] }
 0x3c5   : > { %v1441_v30 = vsel %vm4156_vm5, %v2375_v4, %v2376_v12  ;;  %v1442_v31 = vsel %vm4157_vm13, %v2376_v12, %v2375_v4  ;;  %1990 = vmatpush1.bf16.msk.msra.mxu0 %vm4158_vm0, %v1988_v22  ;;  %vm1995_vm3 = vmpackc.low %vm4159_vm8, %vm2420_vm4  ;;  %v1449_v24 = vsel %vm4160_vm15, %v2380_v26, %v2381_v19  ;;  %vm4166_vm5 = vcmp.lt.s32.totalorder %v2689_v37, 111 }
 0x3c6   : > { %v1991_v28 = vpack.c.bf16 %v1442_v31, %v1404_v52  ;;  %v1994_v18 = vpack.c.bf16 %v1441_v30, %v3738_v43  ;;  %v2384_v14 = vpop.permute.xlu1 %2383  ;;  %vm4161_vm10 = vmmov %vm4160_vm15  ;;  %v1462_v35 = vpop.permute.xlu0 %1461  ;;  %vm4167_vm13 = vnez %v3893_v17  ;;  %vm1476_vm4 = vcmask 588800  }
 0x3c7   : > { %v2386_v27 = vunpack.i.h.bf16 %v2384_v14  ;;  %v2385_v9 = vunpack.i.l.bf16 %v2384_v14  ;;  %v1450_v25 = vsel %vm4161_vm10, %v2381_v19, %v2380_v26  ;;  %vm4163_vm6 = vmmov %vm4162_vm11  ;;  %vm4170_vm8 = vnez %v3905_v46 }
 0x3c8   : > { %1993 = vmatprep.subr.msk.bf16.mxu0 %vm1992_vm7, %v1991_v28  ;;  %vm1998_vm9 = vmpackc.low %vm4165_vm14, %vm4164_vm1 }
 0x3c9   : > { %v1457_v47 = vsel %vm4162_vm11, %v2385_v9, %v2386_v27  ;;  %v1458_v29 = vsel %vm4163_vm6, %v2386_v27, %v2385_v9  ;;  %1996 = vmatpush1.bf16.msk.msra.mxu0 %vm1995_vm3, %v1994_v18  ;;  %vm4168_vm0 = vmpackc.low %vm4141_vm2, %vm4167_vm13 }
 0x3ca   : > { %v1997_v53 = vpack.c.bf16 %v1458_v29, %v1450_v25  ;;  %v2000_v34 = vpack.c.bf16 %v1457_v47, %v1449_v24  ;;  %v1464_v36 = vpop.permute.xlu1 %1463  ;;  %vm4169_vm7 = vmmov %vm4166_vm5 }
 0x3cb   : > { %v1466_v11 = vsel %vm4166_vm5, %v1464_v36, %v1462_v35  ;;  %v1465_v23 = vsel %vm4169_vm7, %v1462_v35, %v1464_v36 }
 0x3cc   : > { %1999 = vmatprep.subr.msk.bf16.mxu0 %vm1998_vm9, %v1997_v53 }
 0x3cd   : > { %2002 = vmatpush1.bf16.msk.msra.mxu0 %vm4168_vm0, %v2000_v34 }
 0x3ce   : > { %1777 = vmatprep.subr.msk.mxu0 %vm4143_vm12, %v1466_v11 }
 0x3d1   : > { %1778 = vmatpush1.msk.msra.mxu0 %vm4170_vm8, %v1465_v23 }
 0x3d2   : > { %1779 = vmatmul.mubr.msk.f32.vlgmr.msra.gmra.mrb[2].mxu0 %vm1476_vm4, %v1469_v55 }
 0x3d7   : > { %v1474_v16 = vpop.permute.xlu0 %1473 }
 0x4a5   : > { %v1546_v38 = vpop.f32.mrb[2].mxu0 }
 0x4a6   : > { %v1547_v17 = vadd.f32 %v1546_v38, %v1474_v16  ;;  %v1548_v39 = vpop.f32.mrb[3].mxu0 }
 0x4a7   : > { %v1549_v50 = vadd.f32 %v1548_v39, %v1474_v16 }
 0x4a8   : > { %vm1551_vm2 = vcmp.ge.f32.partialorder %v1547_v17, 0.0  ;;  %v1553_v45 = vmul.f32 0.2, %v1547_v17 }
 0x4a9   : > { %vm1552_vm12 = vcmp.ge.f32.partialorder %v1549_v50, 0.0  ;;  %v1554_v40 = vmul.f32 0.2, %v1549_v50 }
 0x4aa   : > { %v1555_v37 = vsel %vm1551_vm2, %v1547_v17, %v1553_v45 }
 0x4ab   : > { %1557 = vst [vmem:[%s352_s26] sm:$0xff] %v1555_v37  ;;  %v1556_v54 = vsel %vm1552_vm12, %v1549_v50, %v1554_v40 }
 0x4ac   : > { %1558 = vst [vmem:[%s352_s26 + $0x8] sm:$0xff] %v1556_v54 }
 0x4ad PF: > { %s19_s30 = sadd.s32 1, %s2393_s30  }
 0x4ae   : > { %p16_p4 = scmp.ge.s32.totalorder %s19_s30, 4  }
 0x4b0   :  { %18 = sbr.rel (!%p16_p4) target bundleno = 1 (0x1), region = 90 }

</bundles_post_ra>
